<compile_context>
chip_gen: v7x
topology: tpu7x:2x2x1
jax: 0.10.0
libtpu: 0.0.40
codegen_flags: <defaults>
</compile_context>

<pallas_src>
import functools

import jax
import jax.numpy as jnp
import numpy as np
from jax.experimental import pallas as pl
from jax.experimental.pallas import tpu as pltpu


# ------------------------- packed-parameter slot indices -----------------------

# square (C, C) weight slab order in `wsq`
_WS_Q1, _WS_PROJ1, _WS_Q2, _WS_PROJ2, _WS_WP, _WS_PROJ = range(6)
# wide (C, 2C) weight slab order in `wwide`
_WW_QCAT, _WW_KV, _WW_KV1, _WW_KV2 = range(4)
# (1, C) parameter row order in `pvec`
(_V_GQ1, _V_BQ1, _V_GKV1, _V_BKV1, _V_BPROJ1,
 _V_GQ2, _V_BQ2, _V_GKV2, _V_BKV2, _V_BPROJ2,
 _V_BQPOS, _V_BWP, _V_WVP, _V_BPROJ) = range(14)


# ------------------------------- fused kernel ----------------------------------

def fused_local_attn_kernel(q_ref, kv_ref, gmask_ref, widx_ref, wsq_ref, wwide_ref,
                            pvec_ref, bvp_ref, o_ref, ctx_ref, *,
                            b_blk, qn, n_kv, c_dim, num_heads, w_len, sigma, eps,
                            mm_dtype):
    C = c_dim
    q2 = q_ref[...]      # (B_BLK*QN, C) f32 — row-stacked query tokens
    kv2 = kv_ref[...]    # (B_BLK*N,  C) f32 — row-stacked image tokens

    def vrow(i):                                    # packed (1, C) parameter row
        return pvec_ref[i:i + 1, :]

    def mdot(a, b):                                 # MXU matmul, bf16 in / f32 acc
        return jnp.dot(a.astype(mm_dtype), b.astype(mm_dtype),
                       preferred_element_type=jnp.float32)

    def layernorm(x, gi, bi):
        mu = jnp.mean(x, axis=-1, keepdims=True)
        var = jnp.mean(jnp.square(x - mu), axis=-1, keepdims=True)
        return (x - mu) * jax.lax.rsqrt(var + eps) * vrow(gi) + vrow(bi)

    def softmax(x):
        mx = jnp.max(x, axis=-1, keepdims=True)
        e = jnp.exp(x - mx)
        return e * pl.reciprocal(jnp.sum(e, axis=-1, keepdims=True), approx=True)

    def attention_into_ctx(qp, k, v, keys_per_batch, nh, gauss_fn=None):
        """Per-batch / per-head score+softmax+AV; writes heads into ctx scratch."""
        hd = C // nh
        for b in range(b_blk):                      # static unroll
            qs = slice(b * qn, (b + 1) * qn)
            ks = slice(b * keys_per_batch, (b + 1) * keys_per_batch)
            g = None if gauss_fn is None else gauss_fn(b)
            for h in range(nh):                     # static unroll
                hs = slice(h * hd, (h + 1) * hd)
                s = jax.lax.dot_general(
                    qp[qs, hs].astype(mm_dtype), k[ks, hs].astype(mm_dtype),
                    (((1,), (1,)), ((), ())), preferred_element_type=jnp.float32)
                if g is not None:
                    s = s * g
                ctx_ref[qs, hs] = mdot(softmax(s), v[ks, hs])
        return ctx_ref[...]                         # (B_BLK*QN, C)

    def cross_attn(q_in, kv_in, keys_per_batch, wq_i, wkv_i, wproj_i, bproj_i, nh):
        # wq already carries the 1/sqrt(head_dim) scale (folded at pack time).
        qp = mdot(q_in, wsq_ref[wq_i])              # (B_BLK*QN, C)
        kvp = mdot(kv_in, wwide_ref[wkv_i])         # (rows, 2C)
        ctx = attention_into_ctx(qp, kvp[:, :C], kvp[:, C:], keys_per_batch, nh)
        return mdot(ctx, wsq_ref[wproj_i]) + vrow(bproj_i)

    # ---- row-stacked dense projections on the raw inputs.
    # q feeds both the (scaled) main q-projection and q_pos -> fused (C, 2C) slab.
    qcat = mdot(q2, wwide_ref[_WW_QCAT])            # (B_BLK*QN, 2C)
    qp_main = qcat[:, :C]
    p0 = qcat[:, C:] + vrow(_V_BQPOS)

    kvp_main = mdot(kv2, wwide_ref[_WW_KV])         # (B_BLK*N, 2C)
    k_main, v_main = kvp_main[:, :C], kvp_main[:, C:]

    # ---- position branch, computed at the QN unique query rows per batch.
    # q.repeat(1, H, 1) is row-periodic with period QN and softmax over H-fold
    # repeated keys equals softmax over the unique keys, so every stage is the
    # H-fold repeat of this QN-row computation.
    p1 = cross_attn(layernorm(p0, _V_GQ1, _V_BQ1), layernorm(q2, _V_GKV1, _V_BKV1),
                    qn, _WS_Q1, _WW_KV1, _WS_PROJ1, _V_BPROJ1, 2)
    p2 = cross_attn(layernorm(p1, _V_GQ2, _V_BQ2), layernorm(kv2, _V_GKV2, _V_BKV2),
                    n_kv, _WS_Q2, _WW_KV2, _WS_PROJ2, _V_BPROJ2, 2)

    hidden = jnp.tanh(mdot(p2, wsq_ref[_WS_WP]) + vrow(_V_BWP))
    logit = jnp.sum(hidden * vrow(_V_WVP), axis=-1, keepdims=True) + bvp_ref[0, 0]
    # exact sigmoid (the approx reciprocal here was an avoidable divergence)
    p_ts = w_len / (1.0 + jnp.exp(-logit))          # (B_BLK*QN, 1)

    # ---- gaussian locality map, built on the VPU (no MXU selection matmuls).
    widx = widx_ref[...]                            # (1, N): n % W
    gsel = [gmask_ref[j] for j in range(qn)]        # QN one-hot (QN, N) masks
    neg_inv_two_sigma2 = -1.0 / (2.0 * sigma * sigma)

    def gauss_for_batch(b):
        pb = p_ts[b * qn:(b + 1) * qn, :]           # (QN, 1) centres of this batch
        d = widx - pb                               # (QN, N): row j centred at pb[j]
        g_u = jnp.exp(d * d * neg_inv_two_sigma2)   # per-unique-query gaussian
        # gauss[qn_, n] = g_u[(qn_*H + n//W) % QN, n]  via one-hot mask select
        g = gsel[0] * g_u[0:1, :]
        for j in range(1, qn):
            g = g + gsel[j] * g_u[j:j + 1, :]
        return g                                    # (QN, N)

    # ---- main (local) attention.
    ctx = attention_into_ctx(qp_main, k_main, v_main, n_kv, num_heads,
                             gauss_fn=gauss_for_batch)
    out = mdot(ctx, wsq_ref[_WS_PROJ]) + vrow(_V_BPROJ)
    o_ref[...] = out.astype(o_ref.dtype)


# ------------------------------ pallas_call wrapper -----------------------------

def make_local_cross_attention(params, sz, dim, *, D=6, num_heads=1, eps=1e-6,
                               mm_dtype=jnp.bfloat16, batch_block=8):
    """One-time parameter packing; returns a jitted fn(q, kv) -> (bs, QN, C)."""
    H, W = sz
    C = dim
    N = H * W
    assert C % 2 == 0 and C % num_heads == 0
    sigma = D / 2.0
    scale_main = (C // num_heads) ** -0.5
    scale_ca = (C // 2) ** -0.5          # the two cross-attentions use 2 heads

    # ---- weights packed once (hoisted off the per-call path); attention scales
    # folded into the q-projection weights; same-input projections (w_q, w_qpos)
    # fused along the output/lane axis.
    w_qcat = jnp.concatenate([params['w_q'] * scale_main, params['w_qpos']], axis=1)
    wwide = jnp.stack([w_qcat, params['w_kv'], params['w_kv1'], params['w_kv2']],
                      axis=0).astype(mm_dtype)                        # (4, C, 2C)
    wsq = jnp.stack([params['w_q1'] * scale_ca, params['w_proj1'],
                     params['w_q2'] * scale_ca, params['w_proj2'],
                     params['w_Wp'], params['w_proj']],
                    axis=0).astype(mm_dtype)                          # (6, C, C)
    pvec = jnp.concatenate(
        [params['g_q1'], params['b_q1'], params['g_kv1'], params['b_kv1'],
         params['b_proj1'],
         params['g_q2'], params['b_q2'], params['g_kv2'], params['b_kv2'],
         params['b_proj2'],
         params['b_qpos'], params['b_Wp'], params['w_vp'], params['b_proj']],
        axis=0).astype(jnp.float32)                                   # (14, C)
    bvp = params['b_vp'].reshape(1, 1).astype(jnp.float32)            # SMEM scalar
    widx = jnp.asarray((np.arange(N) % W).reshape(1, N), jnp.float32)

    gmask_cache = {}

    def get_gmask(QN):
        # gmask[j, qn, n] = 1  iff  (qn*H + n//W) % QN == j
        if QN not in gmask_cache:
            sel = (np.arange(QN)[:, None] * H + np.arange(N)[None, :] // W) % QN
            gmask_cache[QN] = jnp.asarray(
                np.stack([(sel == j) for j in range(QN)], axis=0).astype(np.float32))
        return gmask_cache[QN]

    def pick_batch_block(bs, QN):
        # largest divisor of bs <= min(batch_block, bs//2) with 8-aligned rows,
        # so v7x keeps >=2 "parallel" grid steps whenever the batch allows it.
        cap = min(batch_block, max(1, bs // 2))
        for b in range(cap, 0, -1):
            if bs % b == 0 and (b * QN) % 8 == 0 and (b * N) % 8 == 0:
                return b
        return bs    # single grid step; block == full array (always tile-legal)

    @jax.jit
    def run(q, kv):
        bs, QN, C_ = q.shape
        assert C_ == C and kv.shape[1] == N and kv.shape[2] == C
        B_BLK = pick_batch_block(bs, QN)
        gmask = get_gmask(QN)

        # Row-stack batches outside the kernel (XLA handles the relayout), so the
        # kernel blocks are 2-D, sublane-dense and directly matmul-ready.
        q2 = q.reshape(bs * QN, C).astype(jnp.float32)
        kv2 = kv.reshape(bs * N, C).astype(jnp.float32)

        kern = functools.partial(
            fused_local_attn_kernel, b_blk=B_BLK, qn=QN, n_kv=N, c_dim=C,
            num_heads=num_heads, w_len=float(W), sigma=sigma, eps=eps,
            mm_dtype=mm_dtype)

        def replicated(a):
            nd = a.ndim
            return pl.BlockSpec(tuple(a.shape), lambda i, _nd=nd: (0,) * _nd)

        out2 = pl.pallas_call(
            kern,
            out_shape=jax.ShapeDtypeStruct((bs * QN, C), jnp.float32),
            grid=(bs // B_BLK,),
            in_specs=[pl.BlockSpec((B_BLK * QN, C), lambda i: (i, 0)),
                      pl.BlockSpec((B_BLK * N, C), lambda i: (i, 0)),
                      replicated(gmask), replicated(widx),
                      replicated(wsq), replicated(wwide), replicated(pvec),
                      pl.BlockSpec(memory_space=pltpu.MemorySpace.SMEM)],
            out_specs=pl.BlockSpec((B_BLK * QN, C), lambda i: (i, 0)),
            scratch_shapes=[pltpu.VMEM((B_BLK * QN, C), jnp.float32)],
            compiler_params=pltpu.CompilerParams(
                dimension_semantics=("parallel",)),
        )(q2, kv2, gmask, widx, wsq, wwide, pvec, bvp)
        return out2.reshape(bs, QN, C)

    return run


def local_cross_attention(q, kv, sz, params, *, D=6, num_heads=1,
                          mm_dtype=jnp.bfloat16):
    """Convenience one-shot wrapper (packs parameters on every call)."""
    fn = make_local_cross_attention(params, sz, q.shape[-1], D=D,
                                    num_heads=num_heads, mm_dtype=mm_dtype)
    return fn(q, kv)


# ----------------------------- parameters (synthetic) ---------------------------

def init_params(key, C):
    names = ['w_q', 'w_kv', 'w_proj', 'w_Wp', 'w_vp', 'w_qpos',
             'w_q1', 'w_kv1', 'w_proj1', 'w_q2', 'w_kv2', 'w_proj2']
    shapes = [(C, C), (C, 2 * C), (C, C), (C, C), (1, C), (C, C),
              (C, C), (C, 2 * C), (C, C), (C, C), (C, 2 * C), (C, C)]
    keys = jax.random.split(key, len(names))
    p = {n: 0.05 * jax.random.normal(k, s, jnp.float32)
         for n, s, k in zip(names, shapes, keys)}
    zeros_c = lambda: jnp.zeros((1, C), jnp.float32)
    ones_c = lambda: jnp.ones((1, C), jnp.float32)
    p.update(b_proj=zeros_c(), b_Wp=zeros_c(), b_vp=jnp.zeros((1, 1), jnp.float32),
             b_qpos=zeros_c(), b_proj1=zeros_c(), b_proj2=zeros_c(),
             g_q1=ones_c(), b_q1=zeros_c(), g_kv1=ones_c(), b_kv1=zeros_c(),
             g_q2=ones_c(), b_q2=zeros_c(), g_kv2=ones_c(), b_kv2=zeros_c())
    return p


# ----------------------- plain-JAX reference (torch-faithful) -------------------

def _ref_layernorm(x, g, b, eps=1e-6):
    mu = jnp.mean(x, -1, keepdims=True)
    var = jnp.mean((x - mu) ** 2, -1, keepdims=True)
    return (x - mu) / jnp.sqrt(var + eps) * g + b


def _ref_cross_attn(qx, kvx, wq, wkv, wproj, bproj, nh):
    bs, QN, C = qx.shape
    N = kvx.shape[1]
    hd = C // nh
    scale = hd ** -0.5
    qp = (qx @ wq).reshape(bs, QN, nh, hd).transpose(0, 2, 1, 3) * scale
    kvp = (kvx @ wkv).reshape(bs, N, 2, nh, hd).transpose(2, 0, 3, 1, 4)
    k, v = kvp[0], kvp[1]
    attn = jax.nn.softmax(jnp.einsum('bhqd,bhkd->bhqk', qp, k), axis=-1)
    x = jnp.einsum('bhqk,bhkd->bhqd', attn, v).transpose(0, 2, 1, 3).reshape(bs, QN, C)
    return x @ wproj + bproj


def reference_forward(q, kv, sz, p, D=6):
    H, W = sz
    bs, QN, C = q.shape
    N = kv.shape[1]
    nh = 1
    scale = (C // nh) ** -0.5
    sigma = D / 2.0

    q_proj = (q @ p['w_q']).reshape(bs, QN, nh, C // nh).transpose(0, 2, 1, 3) * scale
    kvp = (kv @ p['w_kv']).reshape(bs, N, 2, nh, C // nh).transpose(2, 0, 3, 1, 4)
    k, v = kvp[0], kvp[1]

    q_for_pos = jnp.tile(q, (1, H, 1))
    pt = q_for_pos @ p['w_qpos'] + p['b_qpos']
    pt = _ref_cross_attn(_ref_layernorm(pt, p['g_q1'], p['b_q1']),
                         _ref_layernorm(q_for_pos, p['g_kv1'], p['b_kv1']),
                         p['w_q1'], p['w_kv1'], p['w_proj1'], p['b_proj1'], 2)
    pt = _ref_cross_attn(_ref_layernorm(pt, p['g_q2'], p['b_q2']),
                         _ref_layernorm(kv, p['g_kv2'], p['b_kv2']),
                         p['w_q2'], p['w_kv2'], p['w_proj2'], p['b_proj2'], 2)
    hidden = jnp.tanh(pt @ p['w_Wp'] + p['b_Wp'])
    p_t = jnp.sum(hidden * p['w_vp'], -1, keepdims=True) + p['b_vp']
    p_t = jax.nn.sigmoid(p_t) * W                                    # (bs, QN*H, 1)

    indices = jnp.arange(W, dtype=jnp.float32).reshape(1, 1, 1, W)
    p_exp = p_t.reshape(bs, 1, QN * H, 1)
    gauss = jnp.exp(-(indices - p_exp) ** 2 / (2 * sigma ** 2))

    attn = jnp.einsum('bhqd,bhkd->bhqk', q_proj, k)
    attn = attn.reshape(bs, nh, QN * H, W) * gauss
    attn = attn.reshape(bs, nh, QN, N)
    attn = jax.nn.softmax(attn, axis=-1)
    x = jnp.einsum('bhqk,bhkd->bhqd', attn, v).transpose(0, 2, 1, 3).reshape(bs, QN, C)
    return x @ p['w_proj'] + p['b_proj']


# --------------------------------------- main -----------------------------------

if __name__ == "__main__":
    bs, QN, C = 2, 4, 32
    H, W = 4, 8
    N = H * W
    D = 6

    key = jax.random.PRNGKey(0)
    kq, kkv, kp = jax.random.split(key, 3)
    q = jax.random.normal(kq, (bs, QN, C), jnp.float32)
    kv = jax.random.normal(kkv, (bs, N, C), jnp.float32)
    params = init_params(kp, C)

    # parameters packed once; per-call path is reshape + one pallas_call
    attn_fn = make_local_cross_attention(params, (H, W), C, D=D)
    out = jax.block_until_ready(attn_fn(q, kv))
    assert out.shape == (bs, QN, C)
    assert bool(jnp.all(jnp.isfinite(out)))

    with jax.default_matmul_precision("highest"):
        ref = reference_forward(q, kv, (H, W), params, D=D)
    # bf16 MXU operands + approx softmax reciprocals introduce ~1e-3-level
    # differences, well inside this band.
    np.testing.assert_allclose(np.asarray(out), np.asarray(ref),
                               rtol=2e-2, atol=2e-3)

    print("KERNEL_OK")
</pallas_src>

<mosaic_0001>
module attributes {stable_mosaic.version = 11 : i64} {
  func.func @fused_local_attn_kernel(%arg0: i32, %arg1: memref<8x32xf32, #tpu.memory_space<vmem>>, %arg2: memref<64x32xf32, #tpu.memory_space<vmem>>, %arg3: memref<4x4x32xf32, #tpu.memory_space<vmem>>, %arg4: memref<1x32xf32, #tpu.memory_space<vmem>>, %arg5: memref<6x32x32xbf16, #tpu.memory_space<vmem>>, %arg6: memref<4x32x64xbf16, #tpu.memory_space<vmem>>, %arg7: memref<14x32xf32, #tpu.memory_space<vmem>>, %arg8: memref<1x1xf32, #tpu.memory_space<smem>>, %arg9: memref<8x32xf32, #tpu.memory_space<vmem>>, %arg10: memref<8x32xf32, #tpu.memory_space<vmem>>) attributes {dimension_semantics = [#tpu.dimension_semantics<parallel>], iteration_bounds = array<i64: 1>, scalar_prefetch = 0 : i64, scratch_operands = 1 : i64, tpu.core_type = #tpu.core_type<tc>, window_params = [{transform_indices = @transform_0, window_bounds = array<i64: 8, 32>}, {transform_indices = @transform_1, window_bounds = array<i64: 64, 32>}, {pipeline_mode = #tpu.pipeline_mode<synchronous>, transform_indices = @transform_2, window_bounds = array<i64: 4, 4, 32>}, {pipeline_mode = #tpu.pipeline_mode<synchronous>, transform_indices = @transform_3, window_bounds = array<i64: 1, 32>}, {pipeline_mode = #tpu.pipeline_mode<synchronous>, transform_indices = @transform_4, window_bounds = array<i64: 6, 32, 32>}, {pipeline_mode = #tpu.pipeline_mode<synchronous>, transform_indices = @transform_5, window_bounds = array<i64: 4, 32, 64>}, {pipeline_mode = #tpu.pipeline_mode<synchronous>, transform_indices = @transform_6, window_bounds = array<i64: 14, 32>}, {transform_indices = @transform_7, window_bounds = array<i64: 1, 1>}, {transform_indices = @transform_8, window_bounds = array<i64: 8, 32>}]} {
    %c0 = arith.constant 0 : index
    %c0_0 = arith.constant 0 : index
    %0 = vector.load %arg1[%c0, %c0_0] : memref<8x32xf32, #tpu.memory_space<vmem>>, vector<8x32xf32>
    %c0_1 = arith.constant 0 : index
    %c0_2 = arith.constant 0 : index
    %1 = vector.load %arg2[%c0_1, %c0_2] : memref<64x32xf32, #tpu.memory_space<vmem>>, vector<64x32xf32>
    %c0_3 = arith.constant 0 : index
    %c0_4 = arith.constant 0 : index
    %c0_5 = arith.constant 0 : index
    %2 = vector.load %arg6[%c0_3, %c0_4, %c0_5] : memref<4x32x64xbf16, #tpu.memory_space<vmem>>, vector<1x32x64xbf16>
    %3 = vector.shape_cast %2 : vector<1x32x64xbf16> to vector<32x64xbf16>
    %4 = arith.truncf %0 : vector<8x32xf32> to vector<8x32xbf16>
    %cst = arith.constant dense<0.000000e+00> : vector<8x64xf32>
    %5 = tpu.matmul %4, %3, %cst {dimension_numbers = #tpu.dot_dimension_numbers<[1], [0], [0], [1], [0, 0, 1, 1], [], []>} : vector<8x32xbf16>, vector<32x64xbf16>, vector<8x64xf32> -> vector<8x64xf32>
    %6 = vector.extract_strided_slice %5 {offsets = [0, 0], sizes = [8, 32], strides = [1, 1]} : vector<8x64xf32> to vector<8x32xf32>
    %7 = vector.extract_strided_slice %5 {offsets = [0, 32], sizes = [8, 32], strides = [1, 1]} : vector<8x64xf32> to vector<8x32xf32>
    %c10 = arith.constant 10 : index
    %c0_6 = arith.constant 0 : index
    %8 = vector.load %arg7[%c10, %c0_6] : memref<14x32xf32, #tpu.memory_space<vmem>>, vector<1x32xf32>
    %9 = vector.broadcast %8 : vector<1x32xf32> to vector<8x32xf32>
    %10 = arith.addf %7, %9 : vector<8x32xf32>
    %c1 = arith.constant 1 : index
    %c0_7 = arith.constant 0 : index
    %c0_8 = arith.constant 0 : index
    %11 = vector.load %arg6[%c1, %c0_7, %c0_8] : memref<4x32x64xbf16, #tpu.memory_space<vmem>>, vector<1x32x64xbf16>
    %12 = vector.shape_cast %11 : vector<1x32x64xbf16> to vector<32x64xbf16>
    %13 = arith.truncf %1 : vector<64x32xf32> to vector<64x32xbf16>
    %cst_9 = arith.constant dense<0.000000e+00> : vector<64x64xf32>
    %14 = tpu.matmul %13, %12, %cst_9 {dimension_numbers = #tpu.dot_dimension_numbers<[1], [0], [0], [1], [0, 0, 1, 1], [], []>} : vector<64x32xbf16>, vector<32x64xbf16>, vector<64x64xf32> -> vector<64x64xf32>
    %15 = vector.extract_strided_slice %14 {offsets = [0, 0], sizes = [64, 32], strides = [1, 1]} : vector<64x64xf32> to vector<64x32xf32>
    %16 = vector.extract_strided_slice %14 {offsets = [0, 32], sizes = [64, 32], strides = [1, 1]} : vector<64x64xf32> to vector<64x32xf32>
    %cst_10 = arith.constant dense<0.000000e+00> : vector<8xf32>
    %17 = vector.multi_reduction <add>, %10, %cst_10 [1] : vector<8x32xf32> to vector<8xf32>
    %18 = vector.shape_cast %17 : vector<8xf32> to vector<8x1xf32>
    %cst_11 = arith.constant 3.200000e+01 : f32
    %19 = vector.broadcast %cst_11 : f32 to vector<8x1xf32>
    %20 = arith.divf %18, %19 : vector<8x1xf32>
    %21 = vector.broadcast %20 : vector<8x1xf32> to vector<8x32xf32>
    %22 = arith.subf %10, %21 : vector<8x32xf32>
    %23 = arith.mulf %22, %22 : vector<8x32xf32>
    %cst_12 = arith.constant dense<0.000000e+00> : vector<8xf32>
    %24 = vector.multi_reduction <add>, %23, %cst_12 [1] : vector<8x32xf32> to vector<8xf32>
    %25 = vector.shape_cast %24 : vector<8xf32> to vector<8x1xf32>
    %cst_13 = arith.constant 3.200000e+01 : f32
    %26 = vector.broadcast %cst_13 : f32 to vector<8x1xf32>
    %27 = arith.divf %25, %26 : vector<8x1xf32>
    %28 = vector.broadcast %20 : vector<8x1xf32> to vector<8x32xf32>
    %29 = arith.subf %10, %28 : vector<8x32xf32>
    %cst_14 = arith.constant 9.99999997E-7 : f32
    %30 = vector.broadcast %cst_14 : f32 to vector<8x1xf32>
    %31 = arith.addf %27, %30 : vector<8x1xf32>
    %32 = math.rsqrt %31 : vector<8x1xf32>
    %33 = vector.broadcast %32 : vector<8x1xf32> to vector<8x32xf32>
    %34 = arith.mulf %29, %33 : vector<8x32xf32>
    %c0_15 = arith.constant 0 : index
    %c0_16 = arith.constant 0 : index
    %35 = vector.load %arg7[%c0_15, %c0_16] : memref<14x32xf32, #tpu.memory_space<vmem>>, vector<1x32xf32>
    %36 = vector.broadcast %35 : vector<1x32xf32> to vector<8x32xf32>
    %37 = arith.mulf %34, %36 : vector<8x32xf32>
    %c1_17 = arith.constant 1 : index
    %c0_18 = arith.constant 0 : index
    %38 = vector.load %arg7[%c1_17, %c0_18] : memref<14x32xf32, #tpu.memory_space<vmem>>, vector<1x32xf32>
    %39 = vector.broadcast %38 : vector<1x32xf32> to vector<8x32xf32>
    %40 = arith.addf %37, %39 : vector<8x32xf32>
    %cst_19 = arith.constant dense<0.000000e+00> : vector<8xf32>
    %41 = vector.multi_reduction <add>, %0, %cst_19 [1] : vector<8x32xf32> to vector<8xf32>
    %42 = vector.shape_cast %41 : vector<8xf32> to vector<8x1xf32>
    %cst_20 = arith.constant 3.200000e+01 : f32
    %43 = vector.broadcast %cst_20 : f32 to vector<8x1xf32>
    %44 = arith.divf %42, %43 : vector<8x1xf32>
    %45 = vector.broadcast %44 : vector<8x1xf32> to vector<8x32xf32>
    %46 = arith.subf %0, %45 : vector<8x32xf32>
    %47 = arith.mulf %46, %46 : vector<8x32xf32>
    %cst_21 = arith.constant dense<0.000000e+00> : vector<8xf32>
    %48 = vector.multi_reduction <add>, %47, %cst_21 [1] : vector<8x32xf32> to vector<8xf32>
    %49 = vector.shape_cast %48 : vector<8xf32> to vector<8x1xf32>
    %cst_22 = arith.constant 3.200000e+01 : f32
    %50 = vector.broadcast %cst_22 : f32 to vector<8x1xf32>
    %51 = arith.divf %49, %50 : vector<8x1xf32>
    %52 = vector.broadcast %44 : vector<8x1xf32> to vector<8x32xf32>
    %53 = arith.subf %0, %52 : vector<8x32xf32>
    %cst_23 = arith.constant 9.99999997E-7 : f32
    %54 = vector.broadcast %cst_23 : f32 to vector<8x1xf32>
    %55 = arith.addf %51, %54 : vector<8x1xf32>
    %56 = math.rsqrt %55 : vector<8x1xf32>
    %57 = vector.broadcast %56 : vector<8x1xf32> to vector<8x32xf32>
    %58 = arith.mulf %53, %57 : vector<8x32xf32>
    %c2 = arith.constant 2 : index
    %c0_24 = arith.constant 0 : index
    %59 = vector.load %arg7[%c2, %c0_24] : memref<14x32xf32, #tpu.memory_space<vmem>>, vector<1x32xf32>
    %60 = vector.broadcast %59 : vector<1x32xf32> to vector<8x32xf32>
    %61 = arith.mulf %58, %60 : vector<8x32xf32>
    %c3 = arith.constant 3 : index
    %c0_25 = arith.constant 0 : index
    %62 = vector.load %arg7[%c3, %c0_25] : memref<14x32xf32, #tpu.memory_space<vmem>>, vector<1x32xf32>
    %63 = vector.broadcast %62 : vector<1x32xf32> to vector<8x32xf32>
    %64 = arith.addf %61, %63 : vector<8x32xf32>
    %c0_26 = arith.constant 0 : index
    %c0_27 = arith.constant 0 : index
    %c0_28 = arith.constant 0 : index
    %65 = vector.load %arg5[%c0_26, %c0_27, %c0_28] : memref<6x32x32xbf16, #tpu.memory_space<vmem>>, vector<1x32x32xbf16>
    %66 = vector.shape_cast %65 : vector<1x32x32xbf16> to vector<32x32xbf16>
    %67 = arith.truncf %40 : vector<8x32xf32> to vector<8x32xbf16>
    %cst_29 = arith.constant dense<0.000000e+00> : vector<8x32xf32>
    %68 = tpu.matmul %67, %66, %cst_29 {dimension_numbers = #tpu.dot_dimension_numbers<[1], [0], [0], [1], [0, 0, 1, 1], [], []>} : vector<8x32xbf16>, vector<32x32xbf16>, vector<8x32xf32> -> vector<8x32xf32>
    %c2_30 = arith.constant 2 : index
    %c0_31 = arith.constant 0 : index
    %c0_32 = arith.constant 0 : index
    %69 = vector.load %arg6[%c2_30, %c0_31, %c0_32] : memref<4x32x64xbf16, #tpu.memory_space<vmem>>, vector<1x32x64xbf16>
    %70 = vector.shape_cast %69 : vector<1x32x64xbf16> to vector<32x64xbf16>
    %71 = arith.truncf %64 : vector<8x32xf32> to vector<8x32xbf16>
    %cst_33 = arith.constant dense<0.000000e+00> : vector<8x64xf32>
    %72 = tpu.matmul %71, %70, %cst_33 {dimension_numbers = #tpu.dot_dimension_numbers<[1], [0], [0], [1], [0, 0, 1, 1], [], []>} : vector<8x32xbf16>, vector<32x64xbf16>, vector<8x64xf32> -> vector<8x64xf32>
    %73 = vector.extract_strided_slice %72 {offsets = [0, 0], sizes = [8, 32], strides = [1, 1]} : vector<8x64xf32> to vector<8x32xf32>
    %74 = vector.extract_strided_slice %72 {offsets = [0, 32], sizes = [8, 32], strides = [1, 1]} : vector<8x64xf32> to vector<8x32xf32>
    %75 = vector.extract_strided_slice %68 {offsets = [0, 0], sizes = [4, 16], strides = [1, 1]} : vector<8x32xf32> to vector<4x16xf32>
    %76 = arith.truncf %75 : vector<4x16xf32> to vector<4x16xbf16>
    %77 = vector.extract_strided_slice %73 {offsets = [0, 0], sizes = [4, 16], strides = [1, 1]} : vector<8x32xf32> to vector<4x16xf32>
    %78 = arith.truncf %77 : vector<4x16xf32> to vector<4x16xbf16>
    %cst_34 = arith.constant dense<0.000000e+00> : vector<4x4xf32>
    %79 = tpu.matmul %76, %78, %cst_34 {dimension_numbers = #tpu.dot_dimension_numbers<[1], [1], [0], [0], [0, 0, 1, 0], [], []>} : vector<4x16xbf16>, vector<4x16xbf16>, vector<4x4xf32> -> vector<4x4xf32>
    %cst_35 = arith.constant dense<0xFF800000> : vector<4xf32>
    %80 = vector.multi_reduction <maximumf>, %79, %cst_35 [1] : vector<4x4xf32> to vector<4xf32>
    %81 = vector.shape_cast %80 : vector<4xf32> to vector<4x1xf32>
    %82 = vector.broadcast %81 : vector<4x1xf32> to vector<4x4xf32>
    %83 = arith.subf %79, %82 : vector<4x4xf32>
    %84 = math.exp %83 : vector<4x4xf32>
    %cst_36 = arith.constant dense<0.000000e+00> : vector<4xf32>
    %85 = vector.multi_reduction <add>, %84, %cst_36 [1] : vector<4x4xf32> to vector<4xf32>
    %86 = vector.shape_cast %85 : vector<4xf32> to vector<4x1xf32>
    %87 = tpu.reciprocal %86 {approx = true} : vector<4x1xf32> -> vector<4x1xf32>
    %88 = vector.broadcast %87 : vector<4x1xf32> to vector<4x4xf32>
    %89 = arith.mulf %84, %88 : vector<4x4xf32>
    %90 = vector.extract_strided_slice %74 {offsets = [0, 0], sizes = [4, 16], strides = [1, 1]} : vector<8x32xf32> to vector<4x16xf32>
    %91 = arith.truncf %89 : vector<4x4xf32> to vector<4x4xbf16>
    %92 = arith.truncf %90 : vector<4x16xf32> to vector<4x16xbf16>
    %cst_37 = arith.constant dense<0.000000e+00> : vector<4x16xf32>
    %93 = tpu.matmul %91, %92, %cst_37 {dimension_numbers = #tpu.dot_dimension_numbers<[1], [0], [0], [1], [0, 0, 1, 1], [], []>} : vector<4x4xbf16>, vector<4x16xbf16>, vector<4x16xf32> -> vector<4x16xf32>
    %c0_38 = arith.constant 0 : index
    %c0_39 = arith.constant 0 : index
    %94 = vector.load %arg10[%c0_38, %c0_39] : memref<8x32xf32, #tpu.memory_space<vmem>>, vector<4x16xf32>
    tpu.vector_store %arg10[%c0_38, %c0_39], %93 {strides = array<i32>} : memref<8x32xf32, #tpu.memory_space<vmem>>, vector<4x16xf32>,
    %95 = vector.extract_strided_slice %68 {offsets = [0, 16], sizes = [4, 16], strides = [1, 1]} : vector<8x32xf32> to vector<4x16xf32>
    %96 = arith.truncf %95 : vector<4x16xf32> to vector<4x16xbf16>
    %97 = vector.extract_strided_slice %73 {offsets = [0, 16], sizes = [4, 16], strides = [1, 1]} : vector<8x32xf32> to vector<4x16xf32>
    %98 = arith.truncf %97 : vector<4x16xf32> to vector<4x16xbf16>
    %cst_40 = arith.constant dense<0.000000e+00> : vector<4x4xf32>
    %99 = tpu.matmul %96, %98, %cst_40 {dimension_numbers = #tpu.dot_dimension_numbers<[1], [1], [0], [0], [0, 0, 1, 0], [], []>} : vector<4x16xbf16>, vector<4x16xbf16>, vector<4x4xf32> -> vector<4x4xf32>
    %cst_41 = arith.constant dense<0xFF800000> : vector<4xf32>
    %100 = vector.multi_reduction <maximumf>, %99, %cst_41 [1] : vector<4x4xf32> to vector<4xf32>
    %101 = vector.shape_cast %100 : vector<4xf32> to vector<4x1xf32>
    %102 = vector.broadcast %101 : vector<4x1xf32> to vector<4x4xf32>
    %103 = arith.subf %99, %102 : vector<4x4xf32>
    %104 = math.exp %103 : vector<4x4xf32>
    %cst_42 = arith.constant dense<0.000000e+00> : vector<4xf32>
    %105 = vector.multi_reduction <add>, %104, %cst_42 [1] : vector<4x4xf32> to vector<4xf32>
    %106 = vector.shape_cast %105 : vector<4xf32> to vector<4x1xf32>
    %107 = tpu.reciprocal %106 {approx = true} : vector<4x1xf32> -> vector<4x1xf32>
    %108 = vector.broadcast %107 : vector<4x1xf32> to vector<4x4xf32>
    %109 = arith.mulf %104, %108 : vector<4x4xf32>
    %110 = vector.extract_strided_slice %74 {offsets = [0, 16], sizes = [4, 16], strides = [1, 1]} : vector<8x32xf32> to vector<4x16xf32>
    %111 = arith.truncf %109 : vector<4x4xf32> to vector<4x4xbf16>
    %112 = arith.truncf %110 : vector<4x16xf32> to vector<4x16xbf16>
    %cst_43 = arith.constant dense<0.000000e+00> : vector<4x16xf32>
    %113 = tpu.matmul %111, %112, %cst_43 {dimension_numbers = #tpu.dot_dimension_numbers<[1], [0], [0], [1], [0, 0, 1, 1], [], []>} : vector<4x4xbf16>, vector<4x16xbf16>, vector<4x16xf32> -> vector<4x16xf32>
    %c0_44 = arith.constant 0 : index
    %c16 = arith.constant 16 : index
    %114 = vector.load %arg10[%c0_44, %c16] : memref<8x32xf32, #tpu.memory_space<vmem>>, vector<4x16xf32>
    tpu.vector_store %arg10[%c0_44, %c16], %113 {strides = array<i32>} : memref<8x32xf32, #tpu.memory_space<vmem>>, vector<4x16xf32>,
    %115 = vector.extract_strided_slice %68 {offsets = [4, 0], sizes = [4, 16], strides = [1, 1]} : vector<8x32xf32> to vector<4x16xf32>
    %116 = arith.truncf %115 : vector<4x16xf32> to vector<4x16xbf16>
    %117 = vector.extract_strided_slice %73 {offsets = [4, 0], sizes = [4, 16], strides = [1, 1]} : vector<8x32xf32> to vector<4x16xf32>
    %118 = arith.truncf %117 : vector<4x16xf32> to vector<4x16xbf16>
    %cst_45 = arith.constant dense<0.000000e+00> : vector<4x4xf32>
    %119 = tpu.matmul %116, %118, %cst_45 {dimension_numbers = #tpu.dot_dimension_numbers<[1], [1], [0], [0], [0, 0, 1, 0], [], []>} : vector<4x16xbf16>, vector<4x16xbf16>, vector<4x4xf32> -> vector<4x4xf32>
    %cst_46 = arith.constant dense<0xFF800000> : vector<4xf32>
    %120 = vector.multi_reduction <maximumf>, %119, %cst_46 [1] : vector<4x4xf32> to vector<4xf32>
    %121 = vector.shape_cast %120 : vector<4xf32> to vector<4x1xf32>
    %122 = vector.broadcast %121 : vector<4x1xf32> to vector<4x4xf32>
    %123 = arith.subf %119, %122 : vector<4x4xf32>
    %124 = math.exp %123 : vector<4x4xf32>
    %cst_47 = arith.constant dense<0.000000e+00> : vector<4xf32>
    %125 = vector.multi_reduction <add>, %124, %cst_47 [1] : vector<4x4xf32> to vector<4xf32>
    %126 = vector.shape_cast %125 : vector<4xf32> to vector<4x1xf32>
    %127 = tpu.reciprocal %126 {approx = true} : vector<4x1xf32> -> vector<4x1xf32>
    %128 = vector.broadcast %127 : vector<4x1xf32> to vector<4x4xf32>
    %129 = arith.mulf %124, %128 : vector<4x4xf32>
    %130 = vector.extract_strided_slice %74 {offsets = [4, 0], sizes = [4, 16], strides = [1, 1]} : vector<8x32xf32> to vector<4x16xf32>
    %131 = arith.truncf %129 : vector<4x4xf32> to vector<4x4xbf16>
    %132 = arith.truncf %130 : vector<4x16xf32> to vector<4x16xbf16>
    %cst_48 = arith.constant dense<0.000000e+00> : vector<4x16xf32>
    %133 = tpu.matmul %131, %132, %cst_48 {dimension_numbers = #tpu.dot_dimension_numbers<[1], [0], [0], [1], [0, 0, 1, 1], [], []>} : vector<4x4xbf16>, vector<4x16xbf16>, vector<4x16xf32> -> vector<4x16xf32>
    %c4 = arith.constant 4 : index
    %c0_49 = arith.constant 0 : index
    %134 = vector.load %arg10[%c4, %c0_49] : memref<8x32xf32, #tpu.memory_space<vmem>>, vector<4x16xf32>
    tpu.vector_store %arg10[%c4, %c0_49], %133 {strides = array<i32>} : memref<8x32xf32, #tpu.memory_space<vmem>>, vector<4x16xf32>,
    %135 = vector.extract_strided_slice %68 {offsets = [4, 16], sizes = [4, 16], strides = [1, 1]} : vector<8x32xf32> to vector<4x16xf32>
    %136 = arith.truncf %135 : vector<4x16xf32> to vector<4x16xbf16>
    %137 = vector.extract_strided_slice %73 {offsets = [4, 16], sizes = [4, 16], strides = [1, 1]} : vector<8x32xf32> to vector<4x16xf32>
    %138 = arith.truncf %137 : vector<4x16xf32> to vector<4x16xbf16>
    %cst_50 = arith.constant dense<0.000000e+00> : vector<4x4xf32>
    %139 = tpu.matmul %136, %138, %cst_50 {dimension_numbers = #tpu.dot_dimension_numbers<[1], [1], [0], [0], [0, 0, 1, 0], [], []>} : vector<4x16xbf16>, vector<4x16xbf16>, vector<4x4xf32> -> vector<4x4xf32>
    %cst_51 = arith.constant dense<0xFF800000> : vector<4xf32>
    %140 = vector.multi_reduction <maximumf>, %139, %cst_51 [1] : vector<4x4xf32> to vector<4xf32>
    %141 = vector.shape_cast %140 : vector<4xf32> to vector<4x1xf32>
    %142 = vector.broadcast %141 : vector<4x1xf32> to vector<4x4xf32>
    %143 = arith.subf %139, %142 : vector<4x4xf32>
    %144 = math.exp %143 : vector<4x4xf32>
    %cst_52 = arith.constant dense<0.000000e+00> : vector<4xf32>
    %145 = vector.multi_reduction <add>, %144, %cst_52 [1] : vector<4x4xf32> to vector<4xf32>
    %146 = vector.shape_cast %145 : vector<4xf32> to vector<4x1xf32>
    %147 = tpu.reciprocal %146 {approx = true} : vector<4x1xf32> -> vector<4x1xf32>
    %148 = vector.broadcast %147 : vector<4x1xf32> to vector<4x4xf32>
    %149 = arith.mulf %144, %148 : vector<4x4xf32>
    %150 = vector.extract_strided_slice %74 {offsets = [4, 16], sizes = [4, 16], strides = [1, 1]} : vector<8x32xf32> to vector<4x16xf32>
    %151 = arith.truncf %149 : vector<4x4xf32> to vector<4x4xbf16>
    %152 = arith.truncf %150 : vector<4x16xf32> to vector<4x16xbf16>
    %cst_53 = arith.constant dense<0.000000e+00> : vector<4x16xf32>
    %153 = tpu.matmul %151, %152, %cst_53 {dimension_numbers = #tpu.dot_dimension_numbers<[1], [0], [0], [1], [0, 0, 1, 1], [], []>} : vector<4x4xbf16>, vector<4x16xbf16>, vector<4x16xf32> -> vector<4x16xf32>
    %c4_54 = arith.constant 4 : index
    %c16_55 = arith.constant 16 : index
    %154 = vector.load %arg10[%c4_54, %c16_55] : memref<8x32xf32, #tpu.memory_space<vmem>>, vector<4x16xf32>
    tpu.vector_store %arg10[%c4_54, %c16_55], %153 {strides = array<i32>} : memref<8x32xf32, #tpu.memory_space<vmem>>, vector<4x16xf32>,
    %c0_56 = arith.constant 0 : index
    %c0_57 = arith.constant 0 : index
    %155 = vector.load %arg10[%c0_56, %c0_57] : memref<8x32xf32, #tpu.memory_space<vmem>>, vector<8x32xf32>
    %c1_58 = arith.constant 1 : index
    %c0_59 = arith.constant 0 : index
    %c0_60 = arith.constant 0 : index
    %156 = vector.load %arg5[%c1_58, %c0_59, %c0_60] : memref<6x32x32xbf16, #tpu.memory_space<vmem>>, vector<1x32x32xbf16>
    %157 = vector.shape_cast %156 : vector<1x32x32xbf16> to vector<32x32xbf16>
    %158 = arith.truncf %155 : vector<8x32xf32> to vector<8x32xbf16>
    %cst_61 = arith.constant dense<0.000000e+00> : vector<8x32xf32>
    %159 = tpu.matmul %158, %157, %cst_61 {dimension_numbers = #tpu.dot_dimension_numbers<[1], [0], [0], [1], [0, 0, 1, 1], [], []>} : vector<8x32xbf16>, vector<32x32xbf16>, vector<8x32xf32> -> vector<8x32xf32>
    %c4_62 = arith.constant 4 : index
    %c0_63 = arith.constant 0 : index
    %160 = vector.load %arg7[%c4_62, %c0_63] : memref<14x32xf32, #tpu.memory_space<vmem>>, vector<1x32xf32>
    %161 = vector.broadcast %160 : vector<1x32xf32> to vector<8x32xf32>
    %162 = arith.addf %159, %161 : vector<8x32xf32>
    %cst_64 = arith.constant dense<0.000000e+00> : vector<8xf32>
    %163 = vector.multi_reduction <add>, %162, %cst_64 [1] : vector<8x32xf32> to vector<8xf32>
    %164 = vector.shape_cast %163 : vector<8xf32> to vector<8x1xf32>
    %cst_65 = arith.constant 3.200000e+01 : f32
    %165 = vector.broadcast %cst_65 : f32 to vector<8x1xf32>
    %166 = arith.divf %164, %165 : vector<8x1xf32>
    %167 = vector.broadcast %166 : vector<8x1xf32> to vector<8x32xf32>
    %168 = arith.subf %162, %167 : vector<8x32xf32>
    %169 = arith.mulf %168, %168 : vector<8x32xf32>
    %cst_66 = arith.constant dense<0.000000e+00> : vector<8xf32>
    %170 = vector.multi_reduction <add>, %169, %cst_66 [1] : vector<8x32xf32> to vector<8xf32>
    %171 = vector.shape_cast %170 : vector<8xf32> to vector<8x1xf32>
    %cst_67 = arith.constant 3.200000e+01 : f32
    %172 = vector.broadcast %cst_67 : f32 to vector<8x1xf32>
    %173 = arith.divf %171, %172 : vector<8x1xf32>
    %174 = vector.broadcast %166 : vector<8x1xf32> to vector<8x32xf32>
    %175 = arith.subf %162, %174 : vector<8x32xf32>
    %cst_68 = arith.constant 9.99999997E-7 : f32
    %176 = vector.broadcast %cst_68 : f32 to vector<8x1xf32>
    %177 = arith.addf %173, %176 : vector<8x1xf32>
    %178 = math.rsqrt %177 : vector<8x1xf32>
    %179 = vector.broadcast %178 : vector<8x1xf32> to vector<8x32xf32>
    %180 = arith.mulf %175, %179 : vector<8x32xf32>
    %c5 = arith.constant 5 : index
    %c0_69 = arith.constant 0 : index
    %181 = vector.load %arg7[%c5, %c0_69] : memref<14x32xf32, #tpu.memory_space<vmem>>, vector<1x32xf32>
    %182 = vector.broadcast %181 : vector<1x32xf32> to vector<8x32xf32>
    %183 = arith.mulf %180, %182 : vector<8x32xf32>
    %c6 = arith.constant 6 : index
    %c0_70 = arith.constant 0 : index
    %184 = vector.load %arg7[%c6, %c0_70] : memref<14x32xf32, #tpu.memory_space<vmem>>, vector<1x32xf32>
    %185 = vector.broadcast %184 : vector<1x32xf32> to vector<8x32xf32>
    %186 = arith.addf %183, %185 : vector<8x32xf32>
    %cst_71 = arith.constant dense<0.000000e+00> : vector<64xf32>
    %187 = vector.multi_reduction <add>, %1, %cst_71 [1] : vector<64x32xf32> to vector<64xf32>
    %188 = vector.shape_cast %187 : vector<64xf32> to vector<64x1xf32>
    %cst_72 = arith.constant 3.200000e+01 : f32
    %189 = vector.broadcast %cst_72 : f32 to vector<64x1xf32>
    %190 = arith.divf %188, %189 : vector<64x1xf32>
    %191 = vector.broadcast %190 : vector<64x1xf32> to vector<64x32xf32>
    %192 = arith.subf %1, %191 : vector<64x32xf32>
    %193 = arith.mulf %192, %192 : vector<64x32xf32>
    %cst_73 = arith.constant dense<0.000000e+00> : vector<64xf32>
    %194 = vector.multi_reduction <add>, %193, %cst_73 [1] : vector<64x32xf32> to vector<64xf32>
    %195 = vector.shape_cast %194 : vector<64xf32> to vector<64x1xf32>
    %cst_74 = arith.constant 3.200000e+01 : f32
    %196 = vector.broadcast %cst_74 : f32 to vector<64x1xf32>
    %197 = arith.divf %195, %196 : vector<64x1xf32>
    %198 = vector.broadcast %190 : vector<64x1xf32> to vector<64x32xf32>
    %199 = arith.subf %1, %198 : vector<64x32xf32>
    %cst_75 = arith.constant 9.99999997E-7 : f32
    %200 = vector.broadcast %cst_75 : f32 to vector<64x1xf32>
    %201 = arith.addf %197, %200 : vector<64x1xf32>
    %202 = math.rsqrt %201 : vector<64x1xf32>
    %203 = vector.broadcast %202 : vector<64x1xf32> to vector<64x32xf32>
    %204 = arith.mulf %199, %203 : vector<64x32xf32>
    %c7 = arith.constant 7 : index
    %c0_76 = arith.constant 0 : index
    %205 = vector.load %arg7[%c7, %c0_76] : memref<14x32xf32, #tpu.memory_space<vmem>>, vector<1x32xf32>
    %206 = vector.broadcast %205 : vector<1x32xf32> to vector<64x32xf32>
    %207 = arith.mulf %204, %206 : vector<64x32xf32>
    %c8 = arith.constant 8 : index
    %c0_77 = arith.constant 0 : index
    %208 = vector.load %arg7[%c8, %c0_77] : memref<14x32xf32, #tpu.memory_space<vmem>>, vector<1x32xf32>
    %209 = vector.broadcast %208 : vector<1x32xf32> to vector<64x32xf32>
    %210 = arith.addf %207, %209 : vector<64x32xf32>
    %c2_78 = arith.constant 2 : index
    %c0_79 = arith.constant 0 : index
    %c0_80 = arith.constant 0 : index
    %211 = vector.load %arg5[%c2_78, %c0_79, %c0_80] : memref<6x32x32xbf16, #tpu.memory_space<vmem>>, vector<1x32x32xbf16>
    %212 = vector.shape_cast %211 : vector<1x32x32xbf16> to vector<32x32xbf16>
    %213 = arith.truncf %186 : vector<8x32xf32> to vector<8x32xbf16>
    %cst_81 = arith.constant dense<0.000000e+00> : vector<8x32xf32>
    %214 = tpu.matmul %213, %212, %cst_81 {dimension_numbers = #tpu.dot_dimension_numbers<[1], [0], [0], [1], [0, 0, 1, 1], [], []>} : vector<8x32xbf16>, vector<32x32xbf16>, vector<8x32xf32> -> vector<8x32xf32>
    %c3_82 = arith.constant 3 : index
    %c0_83 = arith.constant 0 : index
    %c0_84 = arith.constant 0 : index
    %215 = vector.load %arg6[%c3_82, %c0_83, %c0_84] : memref<4x32x64xbf16, #tpu.memory_space<vmem>>, vector<1x32x64xbf16>
    %216 = vector.shape_cast %215 : vector<1x32x64xbf16> to vector<32x64xbf16>
    %217 = arith.truncf %210 : vector<64x32xf32> to vector<64x32xbf16>
    %cst_85 = arith.constant dense<0.000000e+00> : vector<64x64xf32>
    %218 = tpu.matmul %217, %216, %cst_85 {dimension_numbers = #tpu.dot_dimension_numbers<[1], [0], [0], [1], [0, 0, 1, 1], [], []>} : vector<64x32xbf16>, vector<32x64xbf16>, vector<64x64xf32> -> vector<64x64xf32>
    %219 = vector.extract_strided_slice %218 {offsets = [0, 0], sizes = [64, 32], strides = [1, 1]} : vector<64x64xf32> to vector<64x32xf32>
    %220 = vector.extract_strided_slice %218 {offsets = [0, 32], sizes = [64, 32], strides = [1, 1]} : vector<64x64xf32> to vector<64x32xf32>
    %221 = vector.extract_strided_slice %214 {offsets = [0, 0], sizes = [4, 16], strides = [1, 1]} : vector<8x32xf32> to vector<4x16xf32>
    %222 = arith.truncf %221 : vector<4x16xf32> to vector<4x16xbf16>
    %223 = vector.extract_strided_slice %219 {offsets = [0, 0], sizes = [32, 16], strides = [1, 1]} : vector<64x32xf32> to vector<32x16xf32>
    %224 = arith.truncf %223 : vector<32x16xf32> to vector<32x16xbf16>
    %cst_86 = arith.constant dense<0.000000e+00> : vector<4x32xf32>
    %225 = tpu.matmul %222, %224, %cst_86 {dimension_numbers = #tpu.dot_dimension_numbers<[1], [1], [0], [0], [0, 0, 1, 0], [], []>} : vector<4x16xbf16>, vector<32x16xbf16>, vector<4x32xf32> -> vector<4x32xf32>
    %cst_87 = arith.constant dense<0xFF800000> : vector<4xf32>
    %226 = vector.multi_reduction <maximumf>, %225, %cst_87 [1] : vector<4x32xf32> to vector<4xf32>
    %227 = vector.shape_cast %226 : vector<4xf32> to vector<4x1xf32>
    %228 = vector.broadcast %227 : vector<4x1xf32> to vector<4x32xf32>
    %229 = arith.subf %225, %228 : vector<4x32xf32>
    %230 = math.exp %229 : vector<4x32xf32>
    %cst_88 = arith.constant dense<0.000000e+00> : vector<4xf32>
    %231 = vector.multi_reduction <add>, %230, %cst_88 [1] : vector<4x32xf32> to vector<4xf32>
    %232 = vector.shape_cast %231 : vector<4xf32> to vector<4x1xf32>
    %233 = tpu.reciprocal %232 {approx = true} : vector<4x1xf32> -> vector<4x1xf32>
    %234 = vector.broadcast %233 : vector<4x1xf32> to vector<4x32xf32>
    %235 = arith.mulf %230, %234 : vector<4x32xf32>
    %236 = vector.extract_strided_slice %220 {offsets = [0, 0], sizes = [32, 16], strides = [1, 1]} : vector<64x32xf32> to vector<32x16xf32>
    %237 = arith.truncf %235 : vector<4x32xf32> to vector<4x32xbf16>
    %238 = arith.truncf %236 : vector<32x16xf32> to vector<32x16xbf16>
    %cst_89 = arith.constant dense<0.000000e+00> : vector<4x16xf32>
    %239 = tpu.matmul %237, %238, %cst_89 {dimension_numbers = #tpu.dot_dimension_numbers<[1], [0], [0], [1], [0, 0, 1, 1], [], []>} : vector<4x32xbf16>, vector<32x16xbf16>, vector<4x16xf32> -> vector<4x16xf32>
    %c0_90 = arith.constant 0 : index
    %c0_91 = arith.constant 0 : index
    %240 = vector.load %arg10[%c0_90, %c0_91] : memref<8x32xf32, #tpu.memory_space<vmem>>, vector<4x16xf32>
    tpu.vector_store %arg10[%c0_90, %c0_91], %239 {strides = array<i32>} : memref<8x32xf32, #tpu.memory_space<vmem>>, vector<4x16xf32>,
    %241 = vector.extract_strided_slice %214 {offsets = [0, 16], sizes = [4, 16], strides = [1, 1]} : vector<8x32xf32> to vector<4x16xf32>
    %242 = arith.truncf %241 : vector<4x16xf32> to vector<4x16xbf16>
    %243 = vector.extract_strided_slice %219 {offsets = [0, 16], sizes = [32, 16], strides = [1, 1]} : vector<64x32xf32> to vector<32x16xf32>
    %244 = arith.truncf %243 : vector<32x16xf32> to vector<32x16xbf16>
    %cst_92 = arith.constant dense<0.000000e+00> : vector<4x32xf32>
    %245 = tpu.matmul %242, %244, %cst_92 {dimension_numbers = #tpu.dot_dimension_numbers<[1], [1], [0], [0], [0, 0, 1, 0], [], []>} : vector<4x16xbf16>, vector<32x16xbf16>, vector<4x32xf32> -> vector<4x32xf32>
    %cst_93 = arith.constant dense<0xFF800000> : vector<4xf32>
    %246 = vector.multi_reduction <maximumf>, %245, %cst_93 [1] : vector<4x32xf32> to vector<4xf32>
    %247 = vector.shape_cast %246 : vector<4xf32> to vector<4x1xf32>
    %248 = vector.broadcast %247 : vector<4x1xf32> to vector<4x32xf32>
    %249 = arith.subf %245, %248 : vector<4x32xf32>
    %250 = math.exp %249 : vector<4x32xf32>
    %cst_94 = arith.constant dense<0.000000e+00> : vector<4xf32>
    %251 = vector.multi_reduction <add>, %250, %cst_94 [1] : vector<4x32xf32> to vector<4xf32>
    %252 = vector.shape_cast %251 : vector<4xf32> to vector<4x1xf32>
    %253 = tpu.reciprocal %252 {approx = true} : vector<4x1xf32> -> vector<4x1xf32>
    %254 = vector.broadcast %253 : vector<4x1xf32> to vector<4x32xf32>
    %255 = arith.mulf %250, %254 : vector<4x32xf32>
    %256 = vector.extract_strided_slice %220 {offsets = [0, 16], sizes = [32, 16], strides = [1, 1]} : vector<64x32xf32> to vector<32x16xf32>
    %257 = arith.truncf %255 : vector<4x32xf32> to vector<4x32xbf16>
    %258 = arith.truncf %256 : vector<32x16xf32> to vector<32x16xbf16>
    %cst_95 = arith.constant dense<0.000000e+00> : vector<4x16xf32>
    %259 = tpu.matmul %257, %258, %cst_95 {dimension_numbers = #tpu.dot_dimension_numbers<[1], [0], [0], [1], [0, 0, 1, 1], [], []>} : vector<4x32xbf16>, vector<32x16xbf16>, vector<4x16xf32> -> vector<4x16xf32>
    %c0_96 = arith.constant 0 : index
    %c16_97 = arith.constant 16 : index
    %260 = vector.load %arg10[%c0_96, %c16_97] : memref<8x32xf32, #tpu.memory_space<vmem>>, vector<4x16xf32>
    tpu.vector_store %arg10[%c0_96, %c16_97], %259 {strides = array<i32>} : memref<8x32xf32, #tpu.memory_space<vmem>>, vector<4x16xf32>,
    %261 = vector.extract_strided_slice %214 {offsets = [4, 0], sizes = [4, 16], strides = [1, 1]} : vector<8x32xf32> to vector<4x16xf32>
    %262 = arith.truncf %261 : vector<4x16xf32> to vector<4x16xbf16>
    %263 = vector.extract_strided_slice %219 {offsets = [32, 0], sizes = [32, 16], strides = [1, 1]} : vector<64x32xf32> to vector<32x16xf32>
    %264 = arith.truncf %263 : vector<32x16xf32> to vector<32x16xbf16>
    %cst_98 = arith.constant dense<0.000000e+00> : vector<4x32xf32>
    %265 = tpu.matmul %262, %264, %cst_98 {dimension_numbers = #tpu.dot_dimension_numbers<[1], [1], [0], [0], [0, 0, 1, 0], [], []>} : vector<4x16xbf16>, vector<32x16xbf16>, vector<4x32xf32> -> vector<4x32xf32>
    %cst_99 = arith.constant dense<0xFF800000> : vector<4xf32>
    %266 = vector.multi_reduction <maximumf>, %265, %cst_99 [1] : vector<4x32xf32> to vector<4xf32>
    %267 = vector.shape_cast %266 : vector<4xf32> to vector<4x1xf32>
    %268 = vector.broadcast %267 : vector<4x1xf32> to vector<4x32xf32>
    %269 = arith.subf %265, %268 : vector<4x32xf32>
    %270 = math.exp %269 : vector<4x32xf32>
    %cst_100 = arith.constant dense<0.000000e+00> : vector<4xf32>
    %271 = vector.multi_reduction <add>, %270, %cst_100 [1] : vector<4x32xf32> to vector<4xf32>
    %272 = vector.shape_cast %271 : vector<4xf32> to vector<4x1xf32>
    %273 = tpu.reciprocal %272 {approx = true} : vector<4x1xf32> -> vector<4x1xf32>
    %274 = vector.broadcast %273 : vector<4x1xf32> to vector<4x32xf32>
    %275 = arith.mulf %270, %274 : vector<4x32xf32>
    %276 = vector.extract_strided_slice %220 {offsets = [32, 0], sizes = [32, 16], strides = [1, 1]} : vector<64x32xf32> to vector<32x16xf32>
    %277 = arith.truncf %275 : vector<4x32xf32> to vector<4x32xbf16>
    %278 = arith.truncf %276 : vector<32x16xf32> to vector<32x16xbf16>
    %cst_101 = arith.constant dense<0.000000e+00> : vector<4x16xf32>
    %279 = tpu.matmul %277, %278, %cst_101 {dimension_numbers = #tpu.dot_dimension_numbers<[1], [0], [0], [1], [0, 0, 1, 1], [], []>} : vector<4x32xbf16>, vector<32x16xbf16>, vector<4x16xf32> -> vector<4x16xf32>
    %c4_102 = arith.constant 4 : index
    %c0_103 = arith.constant 0 : index
    %280 = vector.load %arg10[%c4_102, %c0_103] : memref<8x32xf32, #tpu.memory_space<vmem>>, vector<4x16xf32>
    tpu.vector_store %arg10[%c4_102, %c0_103], %279 {strides = array<i32>} : memref<8x32xf32, #tpu.memory_space<vmem>>, vector<4x16xf32>,
    %281 = vector.extract_strided_slice %214 {offsets = [4, 16], sizes = [4, 16], strides = [1, 1]} : vector<8x32xf32> to vector<4x16xf32>
    %282 = arith.truncf %281 : vector<4x16xf32> to vector<4x16xbf16>
    %283 = vector.extract_strided_slice %219 {offsets = [32, 16], sizes = [32, 16], strides = [1, 1]} : vector<64x32xf32> to vector<32x16xf32>
    %284 = arith.truncf %283 : vector<32x16xf32> to vector<32x16xbf16>
    %cst_104 = arith.constant dense<0.000000e+00> : vector<4x32xf32>
    %285 = tpu.matmul %282, %284, %cst_104 {dimension_numbers = #tpu.dot_dimension_numbers<[1], [1], [0], [0], [0, 0, 1, 0], [], []>} : vector<4x16xbf16>, vector<32x16xbf16>, vector<4x32xf32> -> vector<4x32xf32>
    %cst_105 = arith.constant dense<0xFF800000> : vector<4xf32>
    %286 = vector.multi_reduction <maximumf>, %285, %cst_105 [1] : vector<4x32xf32> to vector<4xf32>
    %287 = vector.shape_cast %286 : vector<4xf32> to vector<4x1xf32>
    %288 = vector.broadcast %287 : vector<4x1xf32> to vector<4x32xf32>
    %289 = arith.subf %285, %288 : vector<4x32xf32>
    %290 = math.exp %289 : vector<4x32xf32>
    %cst_106 = arith.constant dense<0.000000e+00> : vector<4xf32>
    %291 = vector.multi_reduction <add>, %290, %cst_106 [1] : vector<4x32xf32> to vector<4xf32>
    %292 = vector.shape_cast %291 : vector<4xf32> to vector<4x1xf32>
    %293 = tpu.reciprocal %292 {approx = true} : vector<4x1xf32> -> vector<4x1xf32>
    %294 = vector.broadcast %293 : vector<4x1xf32> to vector<4x32xf32>
    %295 = arith.mulf %290, %294 : vector<4x32xf32>
    %296 = vector.extract_strided_slice %220 {offsets = [32, 16], sizes = [32, 16], strides = [1, 1]} : vector<64x32xf32> to vector<32x16xf32>
    %297 = arith.truncf %295 : vector<4x32xf32> to vector<4x32xbf16>
    %298 = arith.truncf %296 : vector<32x16xf32> to vector<32x16xbf16>
    %cst_107 = arith.constant dense<0.000000e+00> : vector<4x16xf32>
    %299 = tpu.matmul %297, %298, %cst_107 {dimension_numbers = #tpu.dot_dimension_numbers<[1], [0], [0], [1], [0, 0, 1, 1], [], []>} : vector<4x32xbf16>, vector<32x16xbf16>, vector<4x16xf32> -> vector<4x16xf32>
    %c4_108 = arith.constant 4 : index
    %c16_109 = arith.constant 16 : index
    %300 = vector.load %arg10[%c4_108, %c16_109] : memref<8x32xf32, #tpu.memory_space<vmem>>, vector<4x16xf32>
    tpu.vector_store %arg10[%c4_108, %c16_109], %299 {strides = array<i32>} : memref<8x32xf32, #tpu.memory_space<vmem>>, vector<4x16xf32>,
    %c0_110 = arith.constant 0 : index
    %c0_111 = arith.constant 0 : index
    %301 = vector.load %arg10[%c0_110, %c0_111] : memref<8x32xf32, #tpu.memory_space<vmem>>, vector<8x32xf32>
    %c3_112 = arith.constant 3 : index
    %c0_113 = arith.constant 0 : index
    %c0_114 = arith.constant 0 : index
    %302 = vector.load %arg5[%c3_112, %c0_113, %c0_114] : memref<6x32x32xbf16, #tpu.memory_space<vmem>>, vector<1x32x32xbf16>
    %303 = vector.shape_cast %302 : vector<1x32x32xbf16> to vector<32x32xbf16>
    %304 = arith.truncf %301 : vector<8x32xf32> to vector<8x32xbf16>
    %cst_115 = arith.constant dense<0.000000e+00> : vector<8x32xf32>
    %305 = tpu.matmul %304, %303, %cst_115 {dimension_numbers = #tpu.dot_dimension_numbers<[1], [0], [0], [1], [0, 0, 1, 1], [], []>} : vector<8x32xbf16>, vector<32x32xbf16>, vector<8x32xf32> -> vector<8x32xf32>
    %c9 = arith.constant 9 : index
    %c0_116 = arith.constant 0 : index
    %306 = vector.load %arg7[%c9, %c0_116] : memref<14x32xf32, #tpu.memory_space<vmem>>, vector<1x32xf32>
    %307 = vector.broadcast %306 : vector<1x32xf32> to vector<8x32xf32>
    %308 = arith.addf %305, %307 : vector<8x32xf32>
    %c4_117 = arith.constant 4 : index
    %c0_118 = arith.constant 0 : index
    %c0_119 = arith.constant 0 : index
    %309 = vector.load %arg5[%c4_117, %c0_118, %c0_119] : memref<6x32x32xbf16, #tpu.memory_space<vmem>>, vector<1x32x32xbf16>
    %310 = vector.shape_cast %309 : vector<1x32x32xbf16> to vector<32x32xbf16>
    %311 = arith.truncf %308 : vector<8x32xf32> to vector<8x32xbf16>
    %cst_120 = arith.constant dense<0.000000e+00> : vector<8x32xf32>
    %312 = tpu.matmul %311, %310, %cst_120 {dimension_numbers = #tpu.dot_dimension_numbers<[1], [0], [0], [1], [0, 0, 1, 1], [], []>} : vector<8x32xbf16>, vector<32x32xbf16>, vector<8x32xf32> -> vector<8x32xf32>
    %c11 = arith.constant 11 : index
    %c0_121 = arith.constant 0 : index
    %313 = vector.load %arg7[%c11, %c0_121] : memref<14x32xf32, #tpu.memory_space<vmem>>, vector<1x32xf32>
    %314 = vector.broadcast %313 : vector<1x32xf32> to vector<8x32xf32>
    %315 = arith.addf %312, %314 : vector<8x32xf32>
    %316 = math.tanh %315 : vector<8x32xf32>
    %c12 = arith.constant 12 : index
    %c0_122 = arith.constant 0 : index
    %317 = vector.load %arg7[%c12, %c0_122] : memref<14x32xf32, #tpu.memory_space<vmem>>, vector<1x32xf32>
    %318 = vector.broadcast %317 : vector<1x32xf32> to vector<8x32xf32>
    %319 = arith.mulf %316, %318 : vector<8x32xf32>
    %cst_123 = arith.constant dense<0.000000e+00> : vector<8xf32>
    %320 = vector.multi_reduction <add>, %319, %cst_123 [1] : vector<8x32xf32> to vector<8xf32>
    %321 = vector.shape_cast %320 : vector<8xf32> to vector<8x1xf32>
    %c0_124 = arith.constant 0 : index
    %c0_125 = arith.constant 0 : index
    %322 = memref.load %arg8[%c0_124, %c0_125] : memref<1x1xf32, #tpu.memory_space<smem>>
    %323 = vector.broadcast %322 : f32 to vector<8x1xf32>
    %324 = arith.addf %321, %323 : vector<8x1xf32>
    %cst_126 = arith.constant 0.000000e+00 : f32
    %325 = vector.broadcast %cst_126 : f32 to vector<8x1xf32>
    %326 = arith.subf %325, %324 : vector<8x1xf32>
    %327 = math.exp %326 : vector<8x1xf32>
    %cst_127 = arith.constant 1.000000e+00 : f32
    %328 = vector.broadcast %cst_127 : f32 to vector<8x1xf32>
    %329 = arith.addf %328, %327 : vector<8x1xf32>
    %cst_128 = arith.constant 8.000000e+00 : f32
    %330 = vector.broadcast %cst_128 : f32 to vector<8x1xf32>
    %331 = arith.divf %330, %329 : vector<8x1xf32>
    %c0_129 = arith.constant 0 : index
    %c0_130 = arith.constant 0 : index
    %332 = vector.load %arg4[%c0_129, %c0_130] : memref<1x32xf32, #tpu.memory_space<vmem>>, vector<1x32xf32>
    %c0_131 = arith.constant 0 : index
    %c0_132 = arith.constant 0 : index
    %c0_133 = arith.constant 0 : index
    %333 = vector.load %arg3[%c0_131, %c0_132, %c0_133] : memref<4x4x32xf32, #tpu.memory_space<vmem>>, vector<1x4x32xf32>
    %334 = vector.shape_cast %333 : vector<1x4x32xf32> to vector<4x32xf32>
    %c1_134 = arith.constant 1 : index
    %c0_135 = arith.constant 0 : index
    %c0_136 = arith.constant 0 : index
    %335 = vector.load %arg3[%c1_134, %c0_135, %c0_136] : memref<4x4x32xf32, #tpu.memory_space<vmem>>, vector<1x4x32xf32>
    %336 = vector.shape_cast %335 : vector<1x4x32xf32> to vector<4x32xf32>
    %c2_137 = arith.constant 2 : index
    %c0_138 = arith.constant 0 : index
    %c0_139 = arith.constant 0 : index
    %337 = vector.load %arg3[%c2_137, %c0_138, %c0_139] : memref<4x4x32xf32, #tpu.memory_space<vmem>>, vector<1x4x32xf32>
    %338 = vector.shape_cast %337 : vector<1x4x32xf32> to vector<4x32xf32>
    %c3_140 = arith.constant 3 : index
    %c0_141 = arith.constant 0 : index
    %c0_142 = arith.constant 0 : index
    %339 = vector.load %arg3[%c3_140, %c0_141, %c0_142] : memref<4x4x32xf32, #tpu.memory_space<vmem>>, vector<1x4x32xf32>
    %340 = vector.shape_cast %339 : vector<1x4x32xf32> to vector<4x32xf32>
    %341 = vector.extract_strided_slice %331 {offsets = [0, 0], sizes = [4, 1], strides = [1, 1]} : vector<8x1xf32> to vector<4x1xf32>
    %342 = vector.broadcast %332 : vector<1x32xf32> to vector<4x32xf32>
    %343 = vector.broadcast %341 : vector<4x1xf32> to vector<4x32xf32>
    %344 = arith.subf %342, %343 : vector<4x32xf32>
    %345 = arith.mulf %344, %344 : vector<4x32xf32>
    %cst_143 = arith.constant -0.055555556 : f32
    %346 = vector.broadcast %cst_143 : f32 to vector<4x32xf32>
    %347 = arith.mulf %345, %346 : vector<4x32xf32>
    %348 = math.exp %347 : vector<4x32xf32>
    %349 = vector.extract_strided_slice %348 {offsets = [0, 0], sizes = [1, 32], strides = [1, 1]} : vector<4x32xf32> to vector<1x32xf32>
    %350 = vector.broadcast %349 : vector<1x32xf32> to vector<4x32xf32>
    %351 = arith.mulf %334, %350 : vector<4x32xf32>
    %352 = vector.extract_strided_slice %348 {offsets = [1, 0], sizes = [1, 32], strides = [1, 1]} : vector<4x32xf32> to vector<1x32xf32>
    %353 = vector.broadcast %352 : vector<1x32xf32> to vector<4x32xf32>
    %354 = arith.mulf %336, %353 : vector<4x32xf32>
    %355 = arith.addf %351, %354 : vector<4x32xf32>
    %356 = vector.extract_strided_slice %348 {offsets = [2, 0], sizes = [1, 32], strides = [1, 1]} : vector<4x32xf32> to vector<1x32xf32>
    %357 = vector.broadcast %356 : vector<1x32xf32> to vector<4x32xf32>
    %358 = arith.mulf %338, %357 : vector<4x32xf32>
    %359 = arith.addf %355, %358 : vector<4x32xf32>
    %360 = vector.extract_strided_slice %348 {offsets = [3, 0], sizes = [1, 32], strides = [1, 1]} : vector<4x32xf32> to vector<1x32xf32>
    %361 = vector.broadcast %360 : vector<1x32xf32> to vector<4x32xf32>
    %362 = arith.mulf %340, %361 : vector<4x32xf32>
    %363 = arith.addf %359, %362 : vector<4x32xf32>
    %364 = vector.extract_strided_slice %6 {offsets = [0, 0], sizes = [4, 32], strides = [1, 1]} : vector<8x32xf32> to vector<4x32xf32>
    %365 = arith.truncf %364 : vector<4x32xf32> to vector<4x32xbf16>
    %366 = vector.extract_strided_slice %15 {offsets = [0, 0], sizes = [32, 32], strides = [1, 1]} : vector<64x32xf32> to vector<32x32xf32>
    %367 = arith.truncf %366 : vector<32x32xf32> to vector<32x32xbf16>
    %cst_144 = arith.constant dense<0.000000e+00> : vector<4x32xf32>
    %368 = tpu.matmul %365, %367, %cst_144 {dimension_numbers = #tpu.dot_dimension_numbers<[1], [1], [0], [0], [0, 0, 1, 0], [], []>} : vector<4x32xbf16>, vector<32x32xbf16>, vector<4x32xf32> -> vector<4x32xf32>
    %369 = arith.mulf %368, %363 : vector<4x32xf32>
    %cst_145 = arith.constant dense<0xFF800000> : vector<4xf32>
    %370 = vector.multi_reduction <maximumf>, %369, %cst_145 [1] : vector<4x32xf32> to vector<4xf32>
    %371 = vector.shape_cast %370 : vector<4xf32> to vector<4x1xf32>
    %372 = vector.broadcast %371 : vector<4x1xf32> to vector<4x32xf32>
    %373 = arith.subf %369, %372 : vector<4x32xf32>
    %374 = math.exp %373 : vector<4x32xf32>
    %cst_146 = arith.constant dense<0.000000e+00> : vector<4xf32>
    %375 = vector.multi_reduction <add>, %374, %cst_146 [1] : vector<4x32xf32> to vector<4xf32>
    %376 = vector.shape_cast %375 : vector<4xf32> to vector<4x1xf32>
    %377 = tpu.reciprocal %376 {approx = true} : vector<4x1xf32> -> vector<4x1xf32>
    %378 = vector.broadcast %377 : vector<4x1xf32> to vector<4x32xf32>
    %379 = arith.mulf %374, %378 : vector<4x32xf32>
    %380 = vector.extract_strided_slice %16 {offsets = [0, 0], sizes = [32, 32], strides = [1, 1]} : vector<64x32xf32> to vector<32x32xf32>
    %381 = arith.truncf %379 : vector<4x32xf32> to vector<4x32xbf16>
    %382 = arith.truncf %380 : vector<32x32xf32> to vector<32x32xbf16>
    %cst_147 = arith.constant dense<0.000000e+00> : vector<4x32xf32>
    %383 = tpu.matmul %381, %382, %cst_147 {dimension_numbers = #tpu.dot_dimension_numbers<[1], [0], [0], [1], [0, 0, 1, 1], [], []>} : vector<4x32xbf16>, vector<32x32xbf16>, vector<4x32xf32> -> vector<4x32xf32>
    %c0_148 = arith.constant 0 : index
    %c0_149 = arith.constant 0 : index
    %384 = vector.load %arg10[%c0_148, %c0_149] : memref<8x32xf32, #tpu.memory_space<vmem>>, vector<4x32xf32>
    tpu.vector_store %arg10[%c0_148, %c0_149], %383 {strides = array<i32>} : memref<8x32xf32, #tpu.memory_space<vmem>>, vector<4x32xf32>,
    %385 = vector.extract_strided_slice %331 {offsets = [4, 0], sizes = [4, 1], strides = [1, 1]} : vector<8x1xf32> to vector<4x1xf32>
    %386 = vector.broadcast %332 : vector<1x32xf32> to vector<4x32xf32>
    %387 = vector.broadcast %385 : vector<4x1xf32> to vector<4x32xf32>
    %388 = arith.subf %386, %387 : vector<4x32xf32>
    %389 = arith.mulf %388, %388 : vector<4x32xf32>
    %cst_150 = arith.constant -0.055555556 : f32
    %390 = vector.broadcast %cst_150 : f32 to vector<4x32xf32>
    %391 = arith.mulf %389, %390 : vector<4x32xf32>
    %392 = math.exp %391 : vector<4x32xf32>
    %393 = vector.extract_strided_slice %392 {offsets = [0, 0], sizes = [1, 32], strides = [1, 1]} : vector<4x32xf32> to vector<1x32xf32>
    %394 = vector.broadcast %393 : vector<1x32xf32> to vector<4x32xf32>
    %395 = arith.mulf %334, %394 : vector<4x32xf32>
    %396 = vector.extract_strided_slice %392 {offsets = [1, 0], sizes = [1, 32], strides = [1, 1]} : vector<4x32xf32> to vector<1x32xf32>
    %397 = vector.broadcast %396 : vector<1x32xf32> to vector<4x32xf32>
    %398 = arith.mulf %336, %397 : vector<4x32xf32>
    %399 = arith.addf %395, %398 : vector<4x32xf32>
    %400 = vector.extract_strided_slice %392 {offsets = [2, 0], sizes = [1, 32], strides = [1, 1]} : vector<4x32xf32> to vector<1x32xf32>
    %401 = vector.broadcast %400 : vector<1x32xf32> to vector<4x32xf32>
    %402 = arith.mulf %338, %401 : vector<4x32xf32>
    %403 = arith.addf %399, %402 : vector<4x32xf32>
    %404 = vector.extract_strided_slice %392 {offsets = [3, 0], sizes = [1, 32], strides = [1, 1]} : vector<4x32xf32> to vector<1x32xf32>
    %405 = vector.broadcast %404 : vector<1x32xf32> to vector<4x32xf32>
    %406 = arith.mulf %340, %405 : vector<4x32xf32>
    %407 = arith.addf %403, %406 : vector<4x32xf32>
    %408 = vector.extract_strided_slice %6 {offsets = [4, 0], sizes = [4, 32], strides = [1, 1]} : vector<8x32xf32> to vector<4x32xf32>
    %409 = arith.truncf %408 : vector<4x32xf32> to vector<4x32xbf16>
    %410 = vector.extract_strided_slice %15 {offsets = [32, 0], sizes = [32, 32], strides = [1, 1]} : vector<64x32xf32> to vector<32x32xf32>
    %411 = arith.truncf %410 : vector<32x32xf32> to vector<32x32xbf16>
    %cst_151 = arith.constant dense<0.000000e+00> : vector<4x32xf32>
    %412 = tpu.matmul %409, %411, %cst_151 {dimension_numbers = #tpu.dot_dimension_numbers<[1], [1], [0], [0], [0, 0, 1, 0], [], []>} : vector<4x32xbf16>, vector<32x32xbf16>, vector<4x32xf32> -> vector<4x32xf32>
    %413 = arith.mulf %412, %407 : vector<4x32xf32>
    %cst_152 = arith.constant dense<0xFF800000> : vector<4xf32>
    %414 = vector.multi_reduction <maximumf>, %413, %cst_152 [1] : vector<4x32xf32> to vector<4xf32>
    %415 = vector.shape_cast %414 : vector<4xf32> to vector<4x1xf32>
    %416 = vector.broadcast %415 : vector<4x1xf32> to vector<4x32xf32>
    %417 = arith.subf %413, %416 : vector<4x32xf32>
    %418 = math.exp %417 : vector<4x32xf32>
    %cst_153 = arith.constant dense<0.000000e+00> : vector<4xf32>
    %419 = vector.multi_reduction <add>, %418, %cst_153 [1] : vector<4x32xf32> to vector<4xf32>
    %420 = vector.shape_cast %419 : vector<4xf32> to vector<4x1xf32>
    %421 = tpu.reciprocal %420 {approx = true} : vector<4x1xf32> -> vector<4x1xf32>
    %422 = vector.broadcast %421 : vector<4x1xf32> to vector<4x32xf32>
    %423 = arith.mulf %418, %422 : vector<4x32xf32>
    %424 = vector.extract_strided_slice %16 {offsets = [32, 0], sizes = [32, 32], strides = [1, 1]} : vector<64x32xf32> to vector<32x32xf32>
    %425 = arith.truncf %423 : vector<4x32xf32> to vector<4x32xbf16>
    %426 = arith.truncf %424 : vector<32x32xf32> to vector<32x32xbf16>
    %cst_154 = arith.constant dense<0.000000e+00> : vector<4x32xf32>
    %427 = tpu.matmul %425, %426, %cst_154 {dimension_numbers = #tpu.dot_dimension_numbers<[1], [0], [0], [1], [0, 0, 1, 1], [], []>} : vector<4x32xbf16>, vector<32x32xbf16>, vector<4x32xf32> -> vector<4x32xf32>
    %c4_155 = arith.constant 4 : index
    %c0_156 = arith.constant 0 : index
    %428 = vector.load %arg10[%c4_155, %c0_156] : memref<8x32xf32, #tpu.memory_space<vmem>>, vector<4x32xf32>
    tpu.vector_store %arg10[%c4_155, %c0_156], %427 {strides = array<i32>} : memref<8x32xf32, #tpu.memory_space<vmem>>, vector<4x32xf32>,
    %c0_157 = arith.constant 0 : index
    %c0_158 = arith.constant 0 : index
    %429 = vector.load %arg10[%c0_157, %c0_158] : memref<8x32xf32, #tpu.memory_space<vmem>>, vector<8x32xf32>
    %c5_159 = arith.constant 5 : index
    %c0_160 = arith.constant 0 : index
    %c0_161 = arith.constant 0 : index
    %430 = vector.load %arg5[%c5_159, %c0_160, %c0_161] : memref<6x32x32xbf16, #tpu.memory_space<vmem>>, vector<1x32x32xbf16>
    %431 = vector.shape_cast %430 : vector<1x32x32xbf16> to vector<32x32xbf16>
    %432 = arith.truncf %429 : vector<8x32xf32> to vector<8x32xbf16>
    %cst_162 = arith.constant dense<0.000000e+00> : vector<8x32xf32>
    %433 = tpu.matmul %432, %431, %cst_162 {dimension_numbers = #tpu.dot_dimension_numbers<[1], [0], [0], [1], [0, 0, 1, 1], [], []>} : vector<8x32xbf16>, vector<32x32xbf16>, vector<8x32xf32> -> vector<8x32xf32>
    %c13 = arith.constant 13 : index
    %c0_163 = arith.constant 0 : index
    %434 = vector.load %arg7[%c13, %c0_163] : memref<14x32xf32, #tpu.memory_space<vmem>>, vector<1x32xf32>
    %435 = vector.broadcast %434 : vector<1x32xf32> to vector<8x32xf32>
    %436 = arith.addf %433, %435 : vector<8x32xf32>
    %c0_164 = arith.constant 0 : index
    %c0_165 = arith.constant 0 : index
    %437 = vector.load %arg9[%c0_164, %c0_165] : memref<8x32xf32, #tpu.memory_space<vmem>>, vector<8x32xf32>
    tpu.vector_store %arg9[%c0_164, %c0_165], %436 {strides = array<i32>} : memref<8x32xf32, #tpu.memory_space<vmem>>, vector<8x32xf32>,
    return
  }
  func.func @transform_0(%arg0: i32) -> (i32, i32) {
    %c0_i32 = arith.constant 0 : i32
    %c0_i32_0 = arith.constant 0 : i32
    return %arg0, %c0_i32 : i32, i32
  }
  func.func @transform_1(%arg0: i32) -> (i32, i32) {
    %c0_i32 = arith.constant 0 : i32
    %c0_i32_0 = arith.constant 0 : i32
    return %arg0, %c0_i32 : i32, i32
  }
  func.func @transform_2(%arg0: i32) -> (i32, i32, i32) {
    %c0_i32 = arith.constant 0 : i32
    %c0_i32_0 = arith.constant 0 : i32
    %c0_i32_1 = arith.constant 0 : i32
    %c0_i32_2 = arith.constant 0 : i32
    return %c0_i32, %c0_i32_0, %c0_i32_1 : i32, i32, i32
  }
  func.func @transform_3(%arg0: i32) -> (i32, i32) {
    %c0_i32 = arith.constant 0 : i32
    %c0_i32_0 = arith.constant 0 : i32
    %c0_i32_1 = arith.constant 0 : i32
    return %c0_i32, %c0_i32_0 : i32, i32
  }
  func.func @transform_4(%arg0: i32) -> (i32, i32, i32) {
    %c0_i32 = arith.constant 0 : i32
    %c0_i32_0 = arith.constant 0 : i32
    %c0_i32_1 = arith.constant 0 : i32
    %c0_i32_2 = arith.constant 0 : i32
    return %c0_i32, %c0_i32_0, %c0_i32_1 : i32, i32, i32
  }
  func.func @transform_5(%arg0: i32) -> (i32, i32, i32) {
    %c0_i32 = arith.constant 0 : i32
    %c0_i32_0 = arith.constant 0 : i32
    %c0_i32_1 = arith.constant 0 : i32
    %c0_i32_2 = arith.constant 0 : i32
    return %c0_i32, %c0_i32_0, %c0_i32_1 : i32, i32, i32
  }
  func.func @transform_6(%arg0: i32) -> (i32, i32) {
    %c0_i32 = arith.constant 0 : i32
    %c0_i32_0 = arith.constant 0 : i32
    %c0_i32_1 = arith.constant 0 : i32
    return %c0_i32, %c0_i32_0 : i32, i32
  }
  func.func @transform_7(%arg0: i32) -> (i32, i32) {
    %c0_i32 = arith.constant 0 : i32
    %c0_i32_0 = arith.constant 0 : i32
    %c0_i32_1 = arith.constant 0 : i32
    return %c0_i32, %c0_i32_0 : i32, i32
  }
  func.func @transform_8(%arg0: i32) -> (i32, i32) {
    %c0_i32 = arith.constant 0 : i32
    %c0_i32_0 = arith.constant 0 : i32
    return %arg0, %c0_i32 : i32, i32
  }
}

</mosaic_0001>

<bundles_post_ra>
// kernel: run.1
= control target key start
LH: loop header
LB: loop body
LE: loop exit
PB: predicated region body
PF: predicated region fallthrough
CT: control target
= control target key end

     0   :  { %14 = vsyncpa [#allocation5], 0  ;;  %s3489_s0 = inlined_call_operand.vmem [shape: f32[8,32], index: 0, kind: input, shape index: {}]   ;;  %s3490_s1 = inlined_call_operand.hbm [shape: f32[64,32], index: 1, kind: input, shape index: {}]   ;;  %s3491_s2 = inlined_call_operand.hbm [shape: f32[4,4,32], index: 2, kind: input, shape index: {}]   ;;  %s3492_s3 = inlined_call_operand.vmem [shape: f32[1,32], index: 3, kind: input, shape index: {}]   ;;  %s3493_s4 = inlined_call_operand.hbm [shape: bf16[6,32,32], index: 4, kind: input, shape index: {}]   ;;  %s3494_s5 = inlined_call_operand.hbm [shape: bf16[4,32,64], index: 5, kind: input, shape index: {}]   ;;  %s3495_s6 = inlined_call_operand.vmem [shape: f32[14,32], index: 6, kind: input, shape index: {}]   ;;  %s3496_s7 = inlined_call_operand.<no memory space> [shape: f32[1,1], index: 7, kind: input, shape index: {}]   ;;  %s3497_s8 = inlined_call_operand.hbm [shape: f32[8,32], index: 8, kind: output, shape index: {}]  }
   0x1   :  { %15 = vsyncpa [#allocation8], 0 }
   0x2   :  { %16 = vsyncpa [#allocation11], 0 }
   0x3   :  { %17 = vsyncpa [#allocation6], 0  ;;  %s2921_s27 = smov [#allocation7]   ;;  %s2803_s9 = scalar_lea.hbm %s3491_s2, 256 }
   0x4   :  { %s37_s28 = sshll.u32 %s2921_s27, 4  ;;  %p2804_p0 = scmp.ne.s32.totalorder %s3491_s2, %s2803_s9  ;;  %s38_s28 = int_to_ptr.vmem [resolvable:$true] %s37_s28 }
   0x5   :  { %p2807_p1 = scmp.lt.u32.totalorder %s2803_s9, %s3491_s2 }
   0x7   :  { %p2809_p2 = pnand %p2807_p1, %p2804_p0 }
   0x9   :  { %2812 = shalt.err (!%p2809_p2)
}
   0xa   :  { %s2813_s14 = scalar_lea.vmem %s38_s28, 256  ;;  %p2818_p4 = scmp.lt.s32.totalorder %s38_s28, %s38_s28 }
   0xb   :  { %p2814_p3 = scmp.ne.s32.totalorder %s38_s28, %s2813_s14  ;;  %p2819_p5 = scmp.lt.s32.totalorder %s2813_s14, %s2813_s14 }
   0xd   :  { %p2820_p6 = por %p2819_p5, %p2818_p4 }
   0xf   :  { %p2821_p7 = pnand %p2820_p6, %p2814_p3 }
  0x11   :  { %2824 = shalt.err (!%p2821_p7)
}
  0x12   :  { %s2922_s15 = smov 64   ;;  %s2923_s16 = smov 4  }
  0x13   :  { %43 = dma.hbm_to_vmem [thread:$0]  %s3491_s2, 256, %s38_s28, [#allocation8], %s2922_s15, %s2922_s15, %s2923_s16  }
  0x14   :  { %s2924_s19 = smov [#allocation4]   ;;  %s2825_s23 = scalar_lea.hbm %s3490_s1, 1024 }
  0x15   :  { %s25_s20 = sshll.u32 %s2924_s19, 4  ;;  %p2826_p8 = scmp.ne.s32.totalorder %s3490_s1, %s2825_s23  ;;  %s26_s20 = int_to_ptr.vmem [resolvable:$true] %s25_s20 }
  0x16   :  { %p2829_p9 = scmp.lt.u32.totalorder %s2825_s23, %s3490_s1 }
  0x18   :  { %p2831_p10 = pnand %p2829_p9, %p2826_p8 }
  0x1a   :  { %2834 = shalt.err (!%p2831_p10)
}
  0x1b   :  { %s2835_s29 = scalar_lea.vmem %s26_s20, 1024  ;;  %p2840_p12 = scmp.lt.s32.totalorder %s26_s20, %s26_s20 }
  0x1c   :  { %p2836_p11 = scmp.ne.s32.totalorder %s26_s20, %s2835_s29  ;;  %p2841_p13 = scmp.lt.s32.totalorder %s2835_s29, %s2835_s29 }
  0x1e   :  { %p2842_p0 = por %p2841_p13, %p2840_p12 }
  0x20   :  { %p2843_p1 = pnand %p2842_p0, %p2836_p11 }
  0x22   :  { %2846 = shalt.err (!%p2843_p1)
}
  0x23   :  { %s2925_s2 = smov 128   ;;  %s2926_s28 = smov 8  }
  0x24   :  { %31 = dma.hbm_to_vmem [thread:$0]  %s3490_s1, 1024, %s26_s20, [#allocation5], %s2925_s2, %s2925_s2, %s2926_s28  }
  0x25   :  { %s2927_s10 = smov [#allocation9]   ;;  %s2928_s12 = smov [#allocation10]  }
  0x26   :  { %s51_s11 = sshll.u32 %s2927_s10, 4  ;;  %s63_s13 = sshll.u32 %s2928_s12, 4  ;;  %s52_s11 = int_to_ptr.vmem [resolvable:$true] %s51_s11  ;;  %s3009_s13 = int_to_ptr.vmem [resolvable:$true] %s63_s13 }
  0x27   :  { %s2847_s18 = scalar_lea.hbm %s3493_s4, 1536 }
  0x28   :  { %p2848_p2 = scmp.ne.s32.totalorder %s3493_s4, %s2847_s18  ;;  %p2851_p3 = scmp.lt.u32.totalorder %s2847_s18, %s3493_s4 }
  0x2a   :  { %p2853_p4 = pnand %p2851_p3, %p2848_p2 }
  0x2c   :  { %2856 = shalt.err (!%p2853_p4)
}
  0x2d   :  { %s2857_s1 = scalar_lea.vmem %s52_s11, 1536  ;;  %p2862_p6 = scmp.lt.s32.totalorder %s52_s11, %s52_s11 }
  0x2e   :  { %p2858_p5 = scmp.ne.s32.totalorder %s52_s11, %s2857_s1  ;;  %p2863_p7 = scmp.lt.s32.totalorder %s2857_s1, %s2857_s1 }
  0x30   :  { %p2864_p8 = por %p2863_p7, %p2862_p6 }
  0x32   :  { %p2865_p9 = pnand %p2864_p8, %p2858_p5 }
  0x34   :  { %2868 = shalt.err (!%p2865_p9)
}
  0x35   :  { %57 = dma.hbm_to_vmem [thread:$0]  %s3493_s4, 1536, %s52_s11, [#allocation8], %s2922_s15, %s2922_s15, %s2923_s16  }
  0x36   :  { %s2869_s27 = scalar_lea.hbm %s3494_s5, 1024 }
  0x37   :  { %p2870_p10 = scmp.ne.s32.totalorder %s3494_s5, %s2869_s27  ;;  %p2873_p11 = scmp.lt.u32.totalorder %s2869_s27, %s3494_s5 }
  0x39   :  { %p2875_p12 = pnand %p2873_p11, %p2870_p10 }
  0x3b   :  { %2878 = shalt.err (!%p2875_p12)
}
  0x3c   :  { %s2879_s9 = scalar_lea.vmem %s3009_s13, 1024  ;;  %p2884_p0 = scmp.lt.s32.totalorder %s3009_s13, %s3009_s13 }
  0x3d   :  { %p2880_p13 = scmp.ne.s32.totalorder %s3009_s13, %s2879_s9  ;;  %p2885_p1 = scmp.lt.s32.totalorder %s2879_s9, %s2879_s9 }
  0x3f   :  { %p2886_p2 = por %p2885_p1, %p2884_p0 }
  0x41   :  { %p2887_p3 = pnand %p2886_p2, %p2880_p13 }
  0x43   :  { %2890 = shalt.err (!%p2887_p3)
}
  0x44   :  { %69 = dma.hbm_to_vmem [thread:$0]  %s3494_s5, 1024, %s3009_s13, [#allocation11], %s2922_s15, %s2922_s15, %s2923_s16  }
  0x45   :  { %2913 = dma.done.wait [#allocation5], 1024  }
  0x46   :  { %2914 = vsyncadd [#allocation5], 4294966272 }
  0x47   :  { %2915 = dma.done.wait [#allocation8], 1792  }
  0x48   :  { %2916 = vsyncadd [#allocation8], 4294965504 }
  0x49   :  { %2917 = dma.done.wait [#allocation11], 1024  }
  0x4a   :  { %2918 = vsyncadd [#allocation11], 4294966272  ;;  %v2929_v0 = vmov 0.0   ;;  %vm2930_vm0 = vmmov 0   ;;  %v2713_v1 = vld [vmem:[#allocation10] sm:$0xff]   ;;  %v2714_v2 = vld [vmem:[#allocation10 + $0x8] sm:$0xff]  }
  0x4b   :  { %2465 = vmatprep.subr.bf16.mxu0 %v2929_v0  ;;  %2469 = vmatprep.mubr.msk.bf16.mxu0 %vm2930_vm0, %v2929_v0  ;;  %v87_v3 = vld [vmem:[%s3489_s0] sm:$0xff]  ;;  %vm113_vm1 = vcmask 261120   ;;  %v2309_v4 = vld [vmem:[%s3495_s6 + $0xa] ss:$0 sm:$0xff]  ;;  %s2931_s16 = smov 32   ;;  %s2932_s0 = smov 96  }
  0x4c   :  { %2466 = vmatpush3.bf16.msra.mxu0 %v2713_v1  ;;  %163 = vrot.lane.b32.xlu0 %v2309_v4, %s2931_s16  ;;  %v100_v5 = vpack.c.bf16 %v87_v3, %v87_v3  ;;  %v307_v12 = vsel %vm113_vm1, %v87_v3, 0.0  ;;  %v2316_v15 = vld [vmem:[%s3495_s6] ss:$0 sm:$0xff]  ;;  %v2317_v27 = vld [vmem:[%s3495_s6 + $0x1] ss:$0 sm:$0xff]  ;;  %v2715_v28 = vld [vmem:[#allocation9] sm:$0xff]  }
  0x4d   :  { %2467 = vmatprep.subr.bf16.mxu0 %v2929_v0  ;;  %v2716_v29 = vld [vmem:[#allocation9 + $0x8] sm:$0xff]   ;;  %v2719_v38 = vld [vmem:[#allocation10 + $0x10] sm:$0xff]   ;;  %v2720_v39 = vld [vmem:[#allocation10 + $0x18] sm:$0xff]   ;;  %vm458_vm2 = vcmask 130048   ;;  %s2933_s1 = smov 112   ;;  %vm505_vm3 = vcmask 27648  }
  0x4e   :  { %2473 = vmatprep.subr.bf16.mxu1 %v2719_v38  ;;  %v2318_v47 = vld [vmem:[%s3495_s6 + $0x2] ss:$0 sm:$0xff]  ;;  %v2717_v48 = vld [vmem:[#allocation10 + $0x20] sm:$0xff]   ;;  %v2319_v51 = vld [vmem:[%s3495_s6 + $0x3] ss:$0 sm:$0xff]  ;;  %s2934_s20 = smov 80  }
  0x4f   :  { %2474 = vmatpush3.bf16.msra.mxu1 %v2719_v38  ;;  %v2718_v52 = vld [vmem:[#allocation10 + $0x28] sm:$0xff]   ;;  %v3096_v55 = vld [vmem:[#allocation4] sm:$0xff]  ;;  %v3098_v56 = vld [vmem:[#allocation4 + $0x8] sm:$0xff]  ;;  %vm525_vm4 = vcmask 1041408   ;;  %vm521_vm5 = vcmask 31744   ;;  %vm569_vm6 = vcmask 125952  }
  0x50   :  { %2468 = vmatpush3.bf16.msra.mxu0 %v2714_v2  ;;  %2475 = vmatprep.subr.bf16.mxu1 %v2720_v39  ;;  %v172_v57 = vpack.c.bf16 %v3098_v56, %v3096_v55  ;;  %v3102_v58 = vld [vmem:[#allocation4 + $0x10] sm:$0xff]  ;;  %v3104_v59 = vld [vmem:[#allocation4 + $0x18] sm:$0xff]  ;;  %v3110_v61 = vld [vmem:[#allocation4 + $0x20] sm:$0xff]  ;;  %s2935_s24 = smov 16   ;;  %vm686_vm7 = vcmask 257152   ;;  %vm1345_vm8 = vcmask 257024  }
  0x51   :  { %2485 = vmatprep.subr.bf16.mxu0 %v2929_v0  ;;  %v173_v60 = vpack.c.bf16 %v3104_v59, %v3102_v58  ;;  %v3112_v62 = vld [vmem:[#allocation4 + $0x28] sm:$0xff]  ;;  %v3116_v1 = vld [vmem:[#allocation4 + $0x30] sm:$0xff]  ;;  %v3118_v2 = vld [vmem:[#allocation4 + $0x38] sm:$0xff] }
  0x52   :  { %2477 = vmatprep.mubr.msk.bf16.mxu1 %vm113_vm1, %v172_v57  ;;  %v174_v63 = vpack.c.bf16 %v3112_v62, %v3110_v61 }
  0x53   :  { %2470 = vmatmul.mubr.msk.bf16.vlgmr.msra.gmra.mrb[0].mxu0 %vm113_vm1, %v100_v5  ;;  %2476 = vmatpush3.bf16.msra.mxu1 %v2720_v39 }
  0x54   :  { %2489 = vmatprep.mubr.msk.bf16.mxu0 %vm2930_vm0, %v2929_v0  ;;  %2486 = vmatpush3.bf16.msra.mxu0 %v2715_v28 }
  0x55   :  { %2487 = vmatprep.subr.bf16.mxu0 %v2929_v0  ;;  %2501 = vmatprep.subr.bf16.mxu1 %v2929_v0 }
  0x56   :  { %2478 = vmatmul.mubr.msk.bf16.vlgmr.msra.gmra.mrb[0].mxu1 %vm113_vm1, %v173_v60 }
  0x57   :  { %2481 = vmatprep.mubr.msk.bf16.mxu1 %vm113_vm1, %v174_v63 }
  0x58   :  { %2488 = vmatpush3.bf16.msra.mxu0 %v2716_v29 }
  0x59   :  { %2493 = vmatprep.subr.bf16.mxu0 %v2929_v0 }
  0xbe   :  { %v164_v6 = vpop.permute.xlu0 %163 }
 0x126   :  { %v3061_v7 = vpop.f32.mrb[0].mxu0 }
 0x127   :  { %v166_v8 = vadd.f32 %v164_v6, %v3061_v7  ;;  %v2471_v9 = vpop.f32.mrb[1].mxu0 }
 0x128   :  { %v154_v10 = vpop.f32.mrb[2].mxu0 }
 0x129   :  { %266 = vrot.lane.b32.xlu0 %v166_v8, %s2932_s0  ;;  %v2472_v11 = vpop.f32.mrb[3].mxu0 }
 0x148   :  { %308 = vadd.xlane.f32.xlu0 %v307_v12 }
 0x15e   :  { %293 = vrot.lane.b32.xlu0 %v2316_v15, %s2931_s16 }
 0x19b   :  { %v267_v13 = vpop.permute.xlu0 %266 }
 0x19c   :  { %v269_v14 = vsel %vm113_vm1, %v267_v13, 0.0 }
 0x19d   :  { %270 = vadd.xlane.f32.xlu1 %v269_v14 }
 0x1d5   :  { %v309_v16 = vpop.xlane.xlu0 %308 }
 0x1d6   :  { %v310_v17 = vmul.f32 0.03125, %v309_v16 }
 0x1d8   :  { %v311_v18 = vsub.f32 %v87_v3, %v310_v17  ;;  %v175_v3 = vpack.c.bf16 %v3118_v2, %v3116_v1 }
 0x1d9   :  { %v294_v35 = vpop.permute.xlu0 %293 }
 0x1da   :  { %v312_v19 = vmul.f32 %v311_v18, %v311_v18  ;;  %2482 = vmatmul.mubr.msk.bf16.gmra.mrb[4].mxu1 %vm113_vm1, %v175_v3 }
 0x1db   :  { %2503 = vmatprep.mubr.msk.bf16.mxu1 %vm2930_vm0, %v2929_v0 }
 0x1dc   :  { %v313_v20 = vsel %vm113_vm1, %v312_v19, 0.0 }
 0x1dd   :  { %314 = vadd.xlane.f32.xlu0 %v313_v20 }
 0x22a   :  { %v271_v21 = vpop.xlane.xlu1 %270 }
 0x22b   :  { %v273_v22 = vmul.f32 0.03125, %v271_v21 }
 0x22d   :  { %v274_v23 = vsub.f32 %v166_v8, %v273_v22 }
 0x22f   :  { %v275_v24 = vmul.f32 %v274_v23, %v274_v23 }
 0x231   :  { %277 = vrot.lane.b32.xlu1 %v275_v24, %s2932_s0 }
 0x26a   :  { %v315_v42 = vpop.xlane.xlu0 %314 }
 0x26b   :  { %v316_v43 = vmul.f32 0.03125, %v315_v42 }
 0x26d   :  { %v317_v44 = vadd.f32 1e-06, %v316_v43 }
 0x2a3   :  { %v278_v25 = vpop.permute.xlu1 %277 }
 0x2a4   :  { %v280_v26 = vsel %vm113_vm1, %v278_v25, 0.0 }
 0x2a5   :  { %281 = vadd.xlane.f32.xlu1 %v280_v26 }
 0x2b6   :  { %303 = vrot.lane.b32.xlu1 %v2317_v27, %s2931_s16 }
 0x332   :  { %v282_v30 = vpop.xlane.xlu1 %281 }
 0x333   :  { %v283_v31 = vmul.f32 0.03125, %v282_v30 }
 0x335   :  { %v284_v32 = vadd.f32 1e-06, %v283_v31 }
 0x336   :  { %v304_v36 = vpop.permute.xlu1 %303 }
 0x337   :  { %2733 = vrsqrt.f32 %v284_v32 }
 0x338   :  { %2735 = vrsqrt.f32 %v317_v44 }
 0x341   :  { %v2734_v33 = vpop.eup %2733 }
 0x342   :  { %v286_v34 = vmul.f32 %v2734_v33, %v274_v23  ;;  %v2736_v45 = vpop.eup %2735 }
 0x343   :  { %v319_v46 = vmul.f32 %v2736_v45, %v311_v18  ;;  %v2479_v18 = vpop.f32.mrb[0].mxu1 }
 0x344   :  { %v296_v37 = vmul.f32 %v294_v35, %v286_v34  ;;  %v234_v19 = vpop.f32.mrb[1].mxu1 }
 0x345   :  { %v325_v49 = vmul.f32 %v2318_v47, %v319_v46  ;;  %v2480_v20 = vpop.f32.mrb[2].mxu1 }
 0x346   :  { %v306_v40 = vadd.f32 %v304_v36, %v296_v37  ;;  %v3143_v21 = vpack.c.bf16 %v2480_v20, %v2479_v18  ;;  %v237_v22 = vpop.f32.mrb[3].mxu1 }
 0x347   :  { %v331_v53 = vadd.f32 %v2319_v51, %v325_v49  ;;  %v3145_v23 = vpack.c.bf16 %v237_v22, %v234_v19  ;;  %v2483_v24 = vpop.f32.mrb[4].mxu1 }
 0x348   :  { %v336_v41 = vpack.c.bf16 %v306_v40, %v306_v40  ;;  %v250_v25 = vpop.f32.mrb[5].mxu1 }
 0x349   :  { %v400_v54 = vpack.c.bf16 %v331_v53, %v331_v53  ;;  %v2484_v26 = vpop.f32.mrb[6].mxu1 }
 0x34a   :  { %338 = vrot.lane.b32.xlu1 %v336_v41, %s2932_s0  ;;  %v3147_v27 = vpack.c.bf16 %v2484_v26, %v2483_v24  ;;  %v253_v28 = vpop.f32.mrb[7].mxu1 }
 0x34b   :  { %v3149_v29 = vpack.c.bf16 %v253_v28, %v250_v25 }
 0x3bc   :  { %v339_v50 = vpop.permute.xlu1 %338 }
 0x3bd   :  { %2490 = vmatmul.mubr.msk.bf16.vlgmr.msra.gmra.mrb[4].mxu0 %vm113_vm1, %v339_v50 }
 0x3be   :  { %2494 = vmatpush3.bf16.msra.mxu0 %v2717_v48  ;;  %2497 = vmatprep.mubr.msk.bf16.mxu0 %vm2930_vm0, %v2929_v0 }
 0x3bf   :  { %2495 = vmatprep.subr.bf16.mxu0 %v2929_v0 }
 0x3c2   :  { %2496 = vmatpush3.bf16.msra.mxu0 %v2718_v52 }
 0x3c3   :  { %2507 = vmatprep.subr.bf16.mxu0 %v2929_v0 }
 0x3c5   :  { %2498 = vmatmul.mubr.msk.bf16.vlgmr.msra.gmra.mrb[8].mxu0 %vm113_vm1, %v400_v54 }
 0x3c6   :  { %2509 = vmatprep.mubr.msk.bf16.mxu0 %vm2930_vm0, %v2929_v0 }
 0x490   :  { %v389_v4 = vpop.f32.mrb[4].mxu0 }
 0x491   :  { %v2491_v5 = vpop.f32.mrb[5].mxu0  ;;  %v456_v15 = vpack.c.bf16 %v389_v4, %v389_v4 }
 0x492   :  { %v392_v6 = vpop.f32.mrb[6].mxu0 }
 0x493   :  { %v2492_v8 = vpop.f32.mrb[7].mxu0  ;;  %v688_v17 = vrot.slane %v456_v15, 2 }
 0x498   :  { %v450_v9 = vpop.f32.mrb[8].mxu0 }
 0x499   :  { %v3126_v10 = vpack.c.bf16 %v450_v9, %v450_v9  ;;  %v2499_v11 = vpop.f32.mrb[9].mxu0 }
 0x49a   :  { %v453_v12 = vpop.f32.mrb[10].mxu0 }
 0x49b   :  { %574 = vrot.lane.b32.xlu1 %v3126_v10, %s2933_s1  ;;  %v2500_v13 = vpop.f32.mrb[11].mxu0  ;;  %v463_v14 = vsel %vm458_vm2, %v3126_v10, 0  ;;  %v3135_v16 = vrot.slane %v3126_v10, 2 }
 0x49c   :  { %2502 = vmatpush3.bf16.xpose.msra.mxu1 %v463_v14 }
 0x49d   :  { %2513 = vmatprep.subr.bf16.mxu1 %v2929_v0  ;;  %v694_v33 = vsel %vm458_vm2, %v3135_v16, 0 }
 0x49f   :  { %572 = vrot.lane.b32.xlu1 %v456_v15, %s2933_s1 }
 0x4a3   :  { %799 = vrot.lane.b32.xlu1 %v3135_v16, %s2933_s1  ;;  %2504 = vmatmul.mubr.msk.bf16.vlgmr.msra.gmra.mrb[8].mxu1 %vm458_vm2, %v456_v15 }
 0x4a4   :  { %2515 = vmatprep.mubr.msk.bf16.mxu1 %vm2930_vm0, %v2929_v0 }
 0x4a7   :  { %797 = vrot.lane.b32.xlu1 %v688_v17, %s2933_s1 }
 0x50d   :  { %v575_v30 = vpop.permute.xlu1 %574 }
 0x50e   :  { %v580_v31 = vsel %vm458_vm2, %v575_v30, 0 }
 0x50f   :  { %2514 = vmatpush3.bf16.xpose.msra.mxu1 %v580_v31 }
 0x510   :  { %2525 = vmatprep.subr.bf16.mxu1 %v2929_v0 }
 0x511   :  { %v573_v32 = vpop.permute.xlu1 %572 }
 0x515   :  { %v800_v34 = vpop.permute.xlu1 %799 }
 0x516   :  { %2516 = vmatmul.mubr.msk.bf16.vlgmr.msra.gmra.mrb[12].mxu1 %vm458_vm2, %v573_v32  ;;  %v805_v35 = vsel %vm458_vm2, %v800_v34, 0 }
 0x517   :  { %2526 = vmatpush3.bf16.xpose.msra.mxu1 %v694_v33  ;;  %2527 = vmatprep.mubr.msk.bf16.mxu1 %vm2930_vm0, %v2929_v0 }
 0x518   :  { %2537 = vmatprep.subr.bf16.mxu1 %v2929_v0 }
 0x519   :  { %v798_v36 = vpop.permute.xlu1 %797 }
 0x51e   :  { %2528 = vmatmul.mubr.msk.bf16.vlgmr.msra.gmra.mrb[16].mxu1 %vm458_vm2, %v688_v17 }
 0x51f   :  { %2538 = vmatpush3.bf16.xpose.msra.mxu1 %v805_v35  ;;  %2539 = vmatprep.mubr.msk.bf16.mxu1 %vm2930_vm0, %v2929_v0 }
 0x520   :  { %2549 = vmatprep.subr.bf16.mxu1 %v2929_v0 }
 0x526   :  { %2540 = vmatmul.mubr.msk.bf16.vlgmr.msra.gmra.mrb[20].mxu1 %vm458_vm2, %v798_v36 }
 0x527   :  { %2553 = vmatprep.mubr.msk.bf16.mxu1 %vm2930_vm0, %v2929_v0 }
 0x576   :  { %v499_v37 = vpop.f32.mrb[8].mxu1 }
 0x577   :  { %v2505_v38 = vpop.f32.mrb[9].mxu1  ;;  %v506_v39 = vsel %vm505_vm3, %v499_v37, -inf }
 0x578   :  { %507 = vmax.xlane.f32.xlu0 %v506_v39  ;;  %v502_v40 = vpop.f32.mrb[10].mxu1 }
 0x579   :  { %v2506_v41 = vpop.f32.mrb[11].mxu1 }
 0x5e9   :  { %v616_v42 = vpop.f32.mrb[12].mxu1 }
 0x5ea   :  { %v2517_v43 = vpop.f32.mrb[13].mxu1  ;;  %v622_v44 = vsel %vm505_vm3, %v616_v42, -inf }
 0x5eb   :  { %623 = vmax.xlane.f32.xlu1 %v622_v44  ;;  %v619_v45 = vpop.f32.mrb[14].mxu1 }
 0x5ec   :  { %v2518_v46 = vpop.f32.mrb[15].mxu1 }
 0x5f1   :  { %v730_v47 = vpop.f32.mrb[16].mxu1 }
 0x5f2   :  { %v2529_v48 = vpop.f32.mrb[17].mxu1  ;;  %v736_v49 = vsel %vm505_vm3, %v730_v47, -inf }
 0x5f3   :  { %737 = vmax.xlane.f32.xlu0 %v736_v49  ;;  %v733_v50 = vpop.f32.mrb[18].mxu1 }
 0x5f4   :  { %v2530_v51 = vpop.f32.mrb[19].mxu1 }
 0x5f9   :  { %v841_v52 = vpop.f32.mrb[20].mxu1 }
 0x5fa   :  { %v2541_v53 = vpop.f32.mrb[21].mxu1  ;;  %v847_v54 = vsel %vm505_vm3, %v841_v52, -inf }
 0x5fb   :  { %848 = vmax.xlane.f32.xlu0 %v847_v54  ;;  %v844_v57 = vpop.f32.mrb[22].mxu1 }
 0x5fc   :  { %634 = vrot.lane.b32.xlu1 %v3126_v10, %s2934_s20  ;;  %v2542_v60 = vpop.f32.mrb[23].mxu1 }
 0x605   :  { %v508_v63 = vpop.xlane.xlu0 %507 }
 0x606   :  { %v509_v3 = vsub.f32 %v499_v37, %v508_v63 }
 0x608   :  { %v510_v4 = vmul.f32 1.442695, %v509_v3 }
 0x60a   :  { %2737 = vpow2.f32 %v510_v4  ;;  %v2721_v4 = vld [vmem:[#allocation9 + $0x10] sm:$0xff]  }
 0x60b   :  { %2550 = vmatpush3.bf16.msra.mxu1 %v2721_v4 }
 0x60c   :  { %2551 = vmatprep.subr.bf16.mxu1 %v2929_v0 }
 0x611   :  { %519 = vrot.lane.b32.xlu0 %v3126_v10, %s2932_s0 }
 0x614   :  { %v2738_v5 = vpop.eup %2737 }
 0x615   :  { %v512_v6 = vsel %vm505_vm3, %v2738_v5, 0.0 }
 0x630   :  { %513 = vadd.xlane.f32.xlu0 %v512_v6 }
 0x678   :  { %v624_v8 = vpop.xlane.xlu1 %623 }
 0x679   :  { %v625_v9 = vsub.f32 %v616_v42, %v624_v8 }
 0x67b   :  { %v626_v11 = vmul.f32 1.442695, %v625_v9 }
 0x67c   :  { %v635_v33 = vpop.permute.xlu1 %634 }
 0x67d   :  { %2739 = vpow2.f32 %v626_v11  ;;  %v640_v35 = vsel %vm525_vm4, %v635_v33, 0 }
 0x680   :  { %v738_v12 = vpop.xlane.xlu0 %737 }
 0x681   :  { %v739_v18 = vsub.f32 %v730_v47, %v738_v12  ;;  %v1004_v12 = vsel %vm113_vm1, %v3096_v55, 0.0 }
 0x683   :  { %v740_v19 = vmul.f32 1.442695, %v739_v18  ;;  %v1007_v18 = vsel %vm113_vm1, %v3098_v56, 0.0 }
 0x685   :  { %2741 = vpow2.f32 %v740_v19  ;;  %v1010_v19 = vsel %vm113_vm1, %v3102_v58, 0.0 }
 0x687   :  { %v2740_v13 = vpop.eup %2739 }
 0x688   :  { %v849_v14 = vpop.xlane.xlu0 %848  ;;  %v628_v15 = vsel %vm505_vm3, %v2740_v13, 0.0 }
 0x689   :  { %629 = vadd.xlane.f32.xlu0 %v628_v15  ;;  %v850_v20 = vsub.f32 %v841_v52, %v849_v14  ;;  %v1013_v14 = vsel %vm113_vm1, %v3104_v59, 0.0 }
 0x68b   :  { %v851_v22 = vmul.f32 1.442695, %v850_v20 }
 0x68c   :  { %v520_v10 = vpop.permute.xlu0 %519 }
 0x68d   :  { %v527_v17 = vsel %vm525_vm4, %v520_v10, 0  ;;  %2743 = vpow2.f32 %v851_v22 }
 0x68e   :  { %2508 = vmatpush3.bf16.msra.mxu0 %v527_v17 }
 0x68f   :  { %2519 = vmatprep.subr.bf16.mxu0 %v2929_v0  ;;  %v2742_v24 = vpop.eup %2741 }
 0x690   :  { %v742_v26 = vsel %vm505_vm3, %v2742_v24, 0.0 }
 0x697   :  { %v2744_v28 = vpop.eup %2743 }
 0x698   :  { %v853_v30 = vsel %vm505_vm3, %v2744_v28, 0.0 }
 0x69f   :  { %748 = vrot.lane.b32.xlu0 %v3135_v16, %s2932_s0 }
 0x6bd   :  { %v514_v25 = vpop.xlane.xlu0 %513 }
 0x6be   :  { %2745 = vrcp.f32 %v514_v25  ;;  %743 = vadd.xlane.f32.xlu0 %v742_v26 }
 0x6c2   :  { %854 = vadd.xlane.f32.xlu0 %v853_v30 }
 0x6c8   :  { %v2746_v31 = vpop.eup %2745 }
 0x6c9   :  { %v516_v32 = vmul.f32 %v2746_v31, %v2738_v5  ;;  %v2722_v5 = vld [vmem:[#allocation9 + $0x18] sm:$0xff]  }
 0x6ca   :  { %2552 = vmatpush3.bf16.msra.mxu1 %v2722_v5 }
 0x6cb   :  { %v517_v34 = vpack.c.bf16 %v516_v32, %v516_v32 }
 0x6cd   :  { %2510 = vmatmul.mubr.msk.bf16.vlgmr.msra.gmra.mrb[12].mxu0 %vm521_vm5, %v517_v34 }
 0x6ce   :  { %2520 = vmatpush3.bf16.msra.mxu0 %v640_v35  ;;  %2521 = vmatprep.mubr.msk.bf16.mxu0 %vm2930_vm0, %v2929_v0 }
 0x6cf   :  { %2531 = vmatprep.subr.bf16.mxu0 %v2929_v0 }
 0x6d8   :  { %859 = vrot.lane.b32.xlu0 %v3135_v16, %s2934_s20 }
 0x716   :  { %v630_v36 = vpop.xlane.xlu0 %629 }
 0x717   :  { %2747 = vrcp.f32 %v630_v36 }
 0x71a   :  { %v749_v39 = vpop.permute.xlu0 %748 }
 0x71b   :  { %v754_v41 = vsel %vm525_vm4, %v749_v39, 0 }
 0x721   :  { %v2748_v37 = vpop.eup %2747 }
 0x722   :  { %v632_v38 = vmul.f32 %v2748_v37, %v2740_v13 }
 0x724   :  { %v633_v40 = vpack.c.bf16 %v632_v38, %v632_v38 }
 0x726   :  { %2522 = vmatmul.mubr.msk.bf16.vlgmr.msra.gmra.mrb[16].mxu0 %vm521_vm5, %v633_v40 }
 0x727   :  { %2532 = vmatpush3.bf16.msra.mxu0 %v754_v41  ;;  %2533 = vmatprep.mubr.msk.bf16.mxu0 %vm2930_vm0, %v2929_v0 }
 0x728   :  { %2543 = vmatprep.subr.bf16.mxu0 %v2929_v0 }
 0x74b   :  { %v744_v42 = vpop.xlane.xlu0 %743 }
 0x74c   :  { %2749 = vrcp.f32 %v744_v42 }
 0x74f   :  { %v855_v43 = vpop.xlane.xlu0 %854 }
 0x750   :  { %2751 = vrcp.f32 %v855_v43 }
 0x753   :  { %v860_v45 = vpop.permute.xlu0 %859 }
 0x754   :  { %v865_v48 = vsel %vm525_vm4, %v860_v45, 0 }
 0x756   :  { %v2750_v16 = vpop.eup %2749 }
 0x757   :  { %v746_v44 = vmul.f32 %v2750_v16, %v2742_v24 }
 0x759   :  { %v747_v46 = vpack.c.bf16 %v746_v44, %v746_v44 }
 0x75a   :  { %v2752_v47 = vpop.eup %2751 }
 0x75b   :  { %2534 = vmatmul.mubr.msk.bf16.vlgmr.msra.gmra.mrb[20].mxu0 %vm521_vm5, %v747_v46  ;;  %v857_v49 = vmul.f32 %v2752_v47, %v2744_v28 }
 0x75c   :  { %2544 = vmatpush3.bf16.msra.mxu0 %v865_v48  ;;  %2545 = vmatprep.mubr.msk.bf16.mxu0 %vm2930_vm0, %v2929_v0 }
 0x75d   :  { %2557 = vmatprep.subr.bf16.mxu0 %v2929_v0  ;;  %v858_v50 = vpack.c.bf16 %v857_v49, %v857_v49 }
 0x763   :  { %2546 = vmatmul.mubr.msk.bf16.vlgmr.msra.gmra.mrb[24].mxu0 %vm521_vm5, %v858_v50 }
 0x764   :  { %2561 = vmatprep.mubr.msk.bf16.mxu0 %vm2930_vm0, %v2929_v0 }
 0x7a0   :  { %v563_v51 = vpop.f32.mrb[12].mxu0 }
 0x7a1   :  { %570 = vst.msk [vmem:[#allocation2] sm:$0xf] %vm569_vm6, %v563_v51  ;;  %v2511_v52 = vpop.f32.mrb[13].mxu0  ;;  %v2723_v51 = vld [vmem:[#allocation10 + $0x30] sm:$0xff]  }
 0x7a2   :  { %v566_v53 = vpop.f32.mrb[14].mxu0  ;;  %2565 = vmatprep.subr.bf16.mxu1 %v2723_v51  ;;  %v2724_v52 = vld [vmem:[#allocation10 + $0x38] sm:$0xff]  }
 0x7a3   :  { %v2512_v54 = vpop.f32.mrb[15].mxu0 }
 0x7f9   :  { %v676_v57 = vpop.f32.mrb[16].mxu0 }
 0x7fa   :  { %683 = vrot.lane.b32.xlu1 %v676_v57, %s2935_s24  ;;  %v2523_v60 = vpop.f32.mrb[17].mxu0 }
 0x7fb   :  { %v679_v63 = vpop.f32.mrb[18].mxu0 }
 0x7fc   :  { %v2524_v3 = vpop.f32.mrb[19].mxu0 }
 0x81e   :  { %1005 = vadd.xlane.f32.xlu1 %v1004_v12 }
 0x822   :  { %1014 = vadd.xlane.f32.xlu1 %v1013_v14 }
 0x82e   :  { %v790_v6 = vpop.f32.mrb[20].mxu0 }
 0x82f   :  { %796 = vst.msk [vmem:[#allocation2 + $0x4] sm:$0xf] %vm569_vm6, %v790_v6  ;;  %v2535_v8 = vpop.f32.mrb[21].mxu0 }
 0x830   :  { %v793_v9 = vpop.f32.mrb[22].mxu0 }
 0x831   :  { %v2536_v11 = vpop.f32.mrb[23].mxu0 }
 0x836   :  { %v901_v13 = vpop.f32.mrb[24].mxu0 }
 0x837   :  { %908 = vrot.lane.b32.xlu0 %v901_v13, %s2935_s24  ;;  %v2547_v15 = vpop.f32.mrb[25].mxu0 }
 0x838   :  { %v904_v10 = vpop.f32.mrb[26].mxu0 }
 0x839   :  { %v2548_v17 = vpop.f32.mrb[27].mxu0 }
 0x856   :  { %1008 = vadd.xlane.f32.xlu0 %v1007_v18 }
 0x85a   :  { %1011 = vadd.xlane.f32.xlu0 %v1010_v19  ;;  %v3236_v19 = vld [vmem:[%s3495_s6 + $0x7] ss:$0 sm:$0xff] }
 0x86c   :  { %v684_v20 = vpop.permute.xlu1 %683 }
 0x86d   :  { %687 = vst.msk [vmem:[#allocation2] sm:$0xf] %vm686_vm7, %v684_v20 }
 0x8a9   :  { %v909_v22 = vpop.permute.xlu0 %908 }
 0x8aa   :  { %911 = vst.msk [vmem:[#allocation2 + $0x4] sm:$0xf] %vm686_vm7, %v909_v22 }
 0x8ab   :  { %v1006_v26 = vpop.xlane.xlu1 %1005 }
 0x8ac   :  { %v1028_v28 = vmul.f32 0.03125, %v1006_v26  ;;  %v3242_v26 = vld [vmem:[%s3495_s6 + $0x8] ss:$0 sm:$0xff] }
 0x8ae   :  { %v1036_v30 = vsub.f32 %v3096_v55, %v1028_v28  ;;  %v2334_v55 = vld [vmem:[%s3495_s6 + $0x4] ss:$0 sm:$0xff] }
 0x8af   :  { %v1015_v40 = vpop.xlane.xlu1 %1014 }
 0x8b0   :  { %v1044_v31 = vmul.f32 %v1036_v30, %v1036_v30  ;;  %v1031_v42 = vmul.f32 0.03125, %v1015_v40  ;;  %v2725_v40 = vld [vmem:[#allocation9 + $0x20] sm:$0xff]  }
 0x8b1   :  { %v912_v24 = vld [vmem:[#allocation2] sm:$0xff]  ;;  %2558 = vmatpush3.bf16.msra.mxu0 %v2725_v40 }
 0x8b2   :  { %v918_v25 = vpack.c.bf16 %v912_v24, %v912_v24  ;;  %v1052_v32 = vsel %vm113_vm1, %v1044_v31, 0.0  ;;  %v1039_v45 = vsub.f32 %v3104_v59, %v1031_v42  ;;  %2559 = vmatprep.subr.bf16.mxu0 %v2929_v0 }
 0x8b3   :  { %1053 = vadd.xlane.f32.xlu1 %v1052_v32 }
 0x8b4   :  { %2554 = vmatmul.mubr.msk.bf16.vlgmr.msra.gmra.mrb[24].mxu1 %vm113_vm1, %v918_v25  ;;  %v1047_v50 = vmul.f32 %v1039_v45, %v1039_v45 }
 0x8b5   :  { %2566 = vmatpush3.bf16.msra.mxu1 %v2723_v51 }
 0x8b6   :  { %2567 = vmatprep.subr.bf16.mxu1 %v2724_v52 }
 0x8b9   :  { %2568 = vmatpush3.bf16.msra.mxu1 %v2724_v52 }
 0x8ba   :  { %2585 = vmatprep.subr.bf16.mxu1 %v2929_v0 }
 0x8e3   :  { %v1009_v33 = vpop.xlane.xlu0 %1008 }
 0x8e4   :  { %v1029_v39 = vmul.f32 0.03125, %v1009_v33 }
 0x8e6   :  { %v1037_v41 = vsub.f32 %v3098_v56, %v1029_v39  ;;  %v1061_v56 = vsel %vm113_vm1, %v1047_v50, 0.0 }
 0x8e7   :  { %v1012_v34 = vpop.xlane.xlu0 %1011 }
 0x8e8   :  { %v1030_v35 = vmul.f32 0.03125, %v1012_v34  ;;  %v1045_v46 = vmul.f32 %v1037_v41, %v1037_v41 }
 0x8ea   :  { %v1038_v36 = vsub.f32 %v3102_v58, %v1030_v35  ;;  %v1055_v49 = vsel %vm113_vm1, %v1045_v46, 0.0  ;;  %v2339_v46 = vld [vmem:[%s3495_s6 + $0x6] ss:$0 sm:$0xff] }
 0x8ec   :  { %v1046_v37 = vmul.f32 %v1038_v36, %v1038_v36 }
 0x8ee   :  { %v1058_v38 = vsel %vm113_vm1, %v1046_v37, 0.0 }
 0x8ef   :  { %1059 = vadd.xlane.f32.xlu1 %v1058_v38 }
 0x940   :  { %v1054_v59 = vpop.xlane.xlu1 %1053 }
 0x941   :  { %v1076_v53 = vmul.f32 0.03125, %v1054_v59 }
 0x943   :  { %v1084_v57 = vadd.f32 1e-06, %v1076_v53 }
 0x945   :  { %2753 = vrsqrt.f32 %v1084_v57  ;;  %v1016_v57 = vsel %vm113_vm1, %v3110_v61, 0.0 }
 0x94f   :  { %v2754_v10 = vpop.eup %2753 }
 0x950   :  { %v1100_v17 = vmul.f32 %v2754_v10, %v1036_v30 }
 0x952   :  { %v1113_v25 = vmul.f32 %v3236_v19, %v1100_v17 }
 0x954   :  { %v1126_v33 = vadd.f32 %v3242_v26, %v1113_v25 }
 0x97c   :  { %v1060_v54 = vpop.xlane.xlu1 %1059 }
 0x97d   :  { %v1078_v60 = vmul.f32 0.03125, %v1060_v54 }
 0x97f   :  { %v1086_v4 = vadd.f32 1e-06, %v1078_v60  ;;  %v1022_v60 = vsel %vm113_vm1, %v3116_v1, 0.0 }
 0x981   :  { %2755 = vrsqrt.f32 %v1086_v4 }
 0x987   :  { %v973_v43 = vpop.f32.mrb[24].mxu1 }
 0x988   :  { %v974_v16 = vadd.f32 %v2334_v55, %v973_v43  ;;  %v2555_v44 = vpop.f32.mrb[25].mxu1 }
 0x989   :  { %v976_v58 = vpop.f32.mrb[26].mxu1  ;;  %v2338_v44 = vld [vmem:[%s3495_s6 + $0x5] ss:$0 sm:$0xff] }
 0x98a   :  { %v2556_v47 = vpop.f32.mrb[27].mxu1  ;;  %v979_v48 = vsel %vm113_vm1, %v974_v16, 0.0 }
 0x98b   :  { %980 = vadd.xlane.f32.xlu0 %v979_v48  ;;  %v2756_v18 = vpop.eup %2755 }
 0x98c   :  { %v1102_v22 = vmul.f32 %v2756_v18, %v1038_v36 }
 0x98e   :  { %v1115_v30 = vmul.f32 %v3236_v19, %v1102_v22 }
 0x98f   :  { %1056 = vadd.xlane.f32.xlu0 %v1055_v49 }
 0x990   :  { %v1128_v37 = vadd.f32 %v3242_v26, %v1115_v30 }
 0x993   :  { %1062 = vadd.xlane.f32.xlu0 %v1061_v56 }
 0xa18   :  { %v981_v63 = vpop.xlane.xlu0 %980 }
 0xa19   :  { %v982_v3 = vmul.f32 0.03125, %v981_v63  ;;  %v1025_v63 = vsel %vm113_vm1, %v3118_v2, 0.0 }
 0xa1b   :  { %v983_v5 = vsub.f32 %v974_v16, %v982_v3 }
 0xa1c   :  { %v1057_v6 = vpop.xlane.xlu0 %1056 }
 0xa1d   :  { %v1077_v8 = vmul.f32 0.03125, %v1057_v6  ;;  %v984_v9 = vmul.f32 %v983_v5, %v983_v5 }
 0xa1f   :  { %v1085_v11 = vadd.f32 1e-06, %v1077_v8  ;;  %v985_v12 = vsel %vm113_vm1, %v984_v9, 0.0 }
 0xa20   :  { %986 = vadd.xlane.f32.xlu1 %v985_v12  ;;  %v1063_v13 = vpop.xlane.xlu0 %1062 }
 0xa21   :  { %2757 = vrsqrt.f32 %v1085_v11  ;;  %v1079_v14 = vmul.f32 0.03125, %v1063_v13 }
 0xa23   :  { %v1087_v15 = vadd.f32 1e-06, %v1079_v14  ;;  %v1019_v14 = vsel %vm113_vm1, %v3112_v62, 0.0 }
 0xa25   :  { %2759 = vrsqrt.f32 %v1087_v15 }
 0xa2b   :  { %v2758_v20 = vpop.eup %2757 }
 0xa2c   :  { %v1101_v24 = vmul.f32 %v2758_v20, %v1037_v41  ;;  %v2726_v41 = vld [vmem:[#allocation9 + $0x28] sm:$0xff]  }
 0xa2d   :  { %2560 = vmatpush3.bf16.msra.mxu0 %v2726_v41 }
 0xa2e   :  { %v1114_v28 = vmul.f32 %v3236_v19, %v1101_v24  ;;  %2577 = vmatprep.subr.bf16.mxu0 %v2929_v0 }
 0xa2f   :  { %v2760_v31 = vpop.eup %2759 }
 0xa30   :  { %v1103_v32 = vmul.f32 %v2760_v31, %v1039_v45  ;;  %v1127_v34 = vadd.f32 %v3242_v26, %v1114_v28 }
 0xa32   :  { %v1116_v35 = vmul.f32 %v3236_v19, %v1103_v32  ;;  %v1200_v36 = vpack.c.bf16 %v1127_v34, %v1126_v33 }
 0xa34   :  { %2569 = vmatprep.mubr.msk.bf16.mxu1 %vm113_vm1, %v1200_v36  ;;  %v1129_v38 = vadd.f32 %v3242_v26, %v1116_v35 }
 0xa36   :  { %v1201_v39 = vpack.c.bf16 %v1129_v38, %v1128_v37 }
 0xa38   :  { %2570 = vmatmul.mubr.msk.bf16.vlgmr.msra.gmra.mrb[28].mxu1 %vm113_vm1, %v1201_v39 }
 0xaad   :  { %v987_v42 = vpop.xlane.xlu1 %986 }
 0xaae   :  { %v988_v55 = vmul.f32 0.03125, %v987_v42 }
 0xab0   :  { %v989_v43 = vadd.f32 1e-06, %v988_v55 }
 0xab2   :  { %2761 = vrsqrt.f32 %v989_v43 }
 0xabc   :  { %v2762_v16 = vpop.eup %2761 }
 0xabd   :  { %v991_v45 = vmul.f32 %v2762_v16, %v983_v5 }
 0xabf   :  { %v997_v58 = vmul.f32 %v2338_v44, %v991_v45 }
 0xac1   :  { %v1003_v47 = vadd.f32 %v2339_v46, %v997_v58 }
 0xac3   :  { %v1139_v48 = vpack.c.bf16 %v1003_v47, %v1003_v47 }
 0xac5   :  { %2562 = vmatmul.mubr.msk.bf16.vlgmr.msra.gmra.mrb[28].mxu0 %vm113_vm1, %v1139_v48 }
 0xac6   :  { %2581 = vmatprep.mubr.msk.bf16.mxu0 %vm2930_vm0, %v2929_v0 }
 0xb0b   :  { %v2571_v49 = vpop.f32.mrb[28].mxu1 }
 0xb0c   :  { %v1262_v50 = vpop.f32.mrb[29].mxu1 }
 0xb0d   :  { %v2572_v56 = vpop.f32.mrb[30].mxu1 }
 0xb0e   :  { %v3264_v51 = vpack.c.bf16 %v2572_v56, %v2571_v49  ;;  %v1265_v52 = vpop.f32.mrb[31].mxu1 }
 0xb0f   :  { %v3266_v59 = vpack.c.bf16 %v1265_v52, %v1262_v50 }
 0xb10   :  { %1415 = vrot.lane.b32.xlu1 %v3264_v51, %s2933_s1  ;;  %v1303_v54 = vsel %vm458_vm2, %v3264_v51, 0 }
 0xb11   :  { %1413 = vrot.lane.b32.xlu0 %v3266_v59, %s2933_s1  ;;  %v1300_v53 = vsel %vm458_vm2, %v3266_v59, 0 }
 0xb12   :  { %2578 = vmatpush3.bf16.xpose.msra.mxu0 %v1300_v53 }
 0xb13   :  { %2579 = vmatprep.subr.bf16.mxu0 %v2929_v0 }
 0xb1a   :  { %2580 = vmatpush3.bf16.xpose.msra.mxu0 %v1303_v54 }
 0xb1b   :  { %2593 = vmatprep.subr.bf16.mxu0 %v2929_v0 }
 0xb30   :  { %1017 = vadd.xlane.f32.xlu0 %v1016_v57 }
 0xb34   :  { %1023 = vadd.xlane.f32.xlu0 %v1022_v60 }
 0xb38   :  { %1026 = vadd.xlane.f32.xlu0 %v1025_v63 }
 0xb82   :  { %v1416_v12 = vpop.permute.xlu1 %1415 }
 0xb83   :  { %v1414_v3 = vpop.permute.xlu0 %1413  ;;  %v1424_v13 = vsel %vm458_vm2, %v1416_v12, 0 }
 0xb84   :  { %v1421_v9 = vsel %vm458_vm2, %v1414_v3, 0 }
 0xb98   :  { %v1189_v4 = vpop.f32.mrb[28].mxu0 }
 0xb99   :  { %v3284_v5 = vpack.c.bf16 %v1189_v4, %v1189_v4  ;;  %v2563_v6 = vpop.f32.mrb[29].mxu0 }
 0xb9a   :  { %v1192_v8 = vpop.f32.mrb[30].mxu0 }
 0xb9b   :  { %1411 = vrot.lane.b32.xlu1 %v3284_v5, %s2933_s1  ;;  %v2564_v11 = vpop.f32.mrb[31].mxu0  ;;  %2582 = vmatmul.mubr.msk.bf16.vlgmr.msra.gmra.mrb[32].mxu0 %vm458_vm2, %v3284_v5 }
 0xb9c   :  { %2594 = vmatpush3.bf16.xpose.msra.mxu0 %v1421_v9  ;;  %2597 = vmatprep.mubr.msk.bf16.mxu0 %vm2930_vm0, %v2929_v0 }
 0xb9d   :  { %2595 = vmatprep.subr.bf16.mxu0 %v2929_v0 }
 0xba4   :  { %2596 = vmatpush3.bf16.xpose.msra.mxu0 %v1424_v13 }
 0xba5   :  { %2617 = vmatprep.subr.bf16.mxu0 %v2929_v0 }
 0xbbd   :  { %v1018_v15 = vpop.xlane.xlu0 %1017 }
 0xbbe   :  { %v1032_v10 = vmul.f32 0.03125, %v1018_v15 }
 0xbbf   :  { %1020 = vadd.xlane.f32.xlu1 %v1019_v14 }
 0xbc0   :  { %v1040_v17 = vsub.f32 %v3110_v61, %v1032_v10 }
 0xbc1   :  { %v1024_v18 = vpop.xlane.xlu0 %1023 }
 0xbc2   :  { %v1034_v20 = vmul.f32 0.03125, %v1024_v18  ;;  %v1048_v22 = vmul.f32 %v1040_v17, %v1040_v17 }
 0xbc4   :  { %v1042_v24 = vsub.f32 %v3116_v1, %v1034_v20  ;;  %v1064_v25 = vsel %vm113_vm1, %v1048_v22, 0.0 }
 0xbc5   :  { %1065 = vadd.xlane.f32.xlu1 %v1064_v25  ;;  %v1027_v32 = vpop.xlane.xlu0 %1026 }
 0xbc6   :  { %v1050_v28 = vmul.f32 %v1042_v24, %v1042_v24  ;;  %v1035_v61 = vmul.f32 0.03125, %v1027_v32 }
 0xbc8   :  { %v1070_v31 = vsel %vm113_vm1, %v1050_v28, 0.0  ;;  %v1043_v35 = vsub.f32 %v3118_v2, %v1035_v61 }
 0xbc9   :  { %1071 = vadd.xlane.f32.xlu1 %v1070_v31 }
 0xbca   :  { %v1051_v37 = vmul.f32 %v1043_v35, %v1043_v35 }
 0xbcc   :  { %v1073_v39 = vsel %vm113_vm1, %v1051_v37, 0.0 }
 0xc0d   :  { %v1412_v30 = vpop.permute.xlu1 %1411 }
 0xc0e   :  { %2598 = vmatmul.mubr.msk.bf16.vlgmr.msra.gmra.mrb[36].mxu0 %vm458_vm2, %v1412_v30 }
 0xc0f   :  { %2621 = vmatprep.mubr.msk.bf16.mxu0 %vm2930_vm0, %v2929_v0 }
 0xc4c   :  { %v1021_v33 = vpop.xlane.xlu1 %1020 }
 0xc4d   :  { %v1033_v34 = vmul.f32 0.03125, %v1021_v33 }
 0xc4f   :  { %v1041_v1 = vsub.f32 %v3112_v62, %v1033_v34 }
 0xc51   :  { %v1049_v36 = vmul.f32 %v1041_v1, %v1041_v1 }
 0xc52   :  { %v1066_v62 = vpop.xlane.xlu1 %1065 }
 0xc53   :  { %v1067_v38 = vsel %vm113_vm1, %v1049_v36, 0.0  ;;  %v1080_v2 = vmul.f32 0.03125, %v1066_v62 }
 0xc54   :  { %1068 = vadd.xlane.f32.xlu0 %v1067_v38 }
 0xc55   :  { %v1088_v44 = vadd.f32 1e-06, %v1080_v2 }
 0xc56   :  { %v1072_v16 = vpop.xlane.xlu1 %1071 }
 0xc57   :  { %v1082_v45 = vmul.f32 0.03125, %v1072_v16  ;;  %2763 = vrsqrt.f32 %v1088_v44 }
 0xc58   :  { %1074 = vadd.xlane.f32.xlu0 %v1073_v39 }
 0xc59   :  { %v1090_v46 = vadd.f32 1e-06, %v1082_v45 }
 0xc5b   :  { %2765 = vrsqrt.f32 %v1090_v46 }
 0xc61   :  { %v2764_v63 = vpop.eup %2763 }
 0xc62   :  { %v1104_v3 = vmul.f32 %v2764_v63, %v1040_v17 }
 0xc64   :  { %v1117_v11 = vmul.f32 %v3236_v19, %v1104_v3 }
 0xc65   :  { %v2766_v4 = vpop.eup %2765 }
 0xc66   :  { %v1106_v8 = vmul.f32 %v2766_v4, %v1042_v24  ;;  %v1130_v15 = vadd.f32 %v3242_v26, %v1117_v11 }
 0xc68   :  { %v1119_v18 = vmul.f32 %v3236_v19, %v1106_v8 }
 0xc6a   :  { %v1132_v17 = vadd.f32 %v3242_v26, %v1119_v18 }
 0xc6e   :  { %v1339_v40 = vpop.f32.mrb[32].mxu0 }
 0xc6f   :  { %v2583_v41 = vpop.f32.mrb[33].mxu0  ;;  %v1346_v42 = vsel %vm1345_vm8, %v1339_v40, -inf }
 0xc70   :  { %1347 = vmax.xlane.f32.xlu1 %v1346_v42  ;;  %v1342_v55 = vpop.f32.mrb[34].mxu0 }
 0xc71   :  { %v2584_v43 = vpop.f32.mrb[35].mxu0 }
 0xc81   :  { %1360 = vrot.lane.b32.xlu1 %v3266_v59, %s2932_s0 }
 0xce1   :  { %v1069_v58 = vpop.xlane.xlu0 %1068  ;;  %v1460_v47 = vpop.f32.mrb[36].mxu0 }
 0xce2   :  { %v1081_v48 = vmul.f32 0.03125, %v1069_v58  ;;  %v2599_v49 = vpop.f32.mrb[37].mxu0  ;;  %v1466_v50 = vsel %vm1345_vm8, %v1460_v47, -inf }
 0xce3   :  { %1467 = vmax.xlane.f32.xlu0 %v1466_v50  ;;  %v1463_v56 = vpop.f32.mrb[38].mxu0 }
 0xce4   :  { %v1089_v52 = vadd.f32 1e-06, %v1081_v48  ;;  %v2600_v53 = vpop.f32.mrb[39].mxu0  ;;  %v1534_v48 = vrot.slane %v3284_v5, 2 }
 0xce5   :  { %v1075_v54 = vpop.xlane.xlu0 %1074 }
 0xce6   :  { %2767 = vrsqrt.f32 %v1089_v52  ;;  %v1083_v57 = vmul.f32 0.03125, %v1075_v54 }
 0xce8   :  { %v1091_v60 = vadd.f32 1e-06, %v1083_v57 }
 0xcea   :  { %2769 = vrsqrt.f32 %v1091_v60 }
 0xcf0   :  { %v2768_v6 = vpop.eup %2767 }
 0xcf1   :  { %v1105_v9 = vmul.f32 %v2768_v6, %v1041_v1 }
 0xcf3   :  { %v1118_v12 = vmul.f32 %v3236_v19, %v1105_v9 }
 0xcf4   :  { %v2770_v13 = vpop.eup %2769 }
 0xcf5   :  { %v1107_v14 = vmul.f32 %v2770_v13, %v1043_v35  ;;  %v1131_v10 = vadd.f32 %v3242_v26, %v1118_v12 }
 0xcf7   :  { %v1202_v20 = vpack.c.bf16 %v1131_v10, %v1130_v15  ;;  %v1120_v22 = vmul.f32 %v3236_v19, %v1107_v14 }
 0xcf9   :  { %2573 = vmatprep.mubr.msk.bf16.mxu1 %vm113_vm1, %v1202_v20  ;;  %v1133_v24 = vadd.f32 %v3242_v26, %v1120_v22 }
 0xcfb   :  { %v1203_v25 = vpack.c.bf16 %v1133_v24, %v1132_v17 }
 0xcfd   :  { %2574 = vmatmul.mubr.msk.bf16.gmra.mrb[32].mxu1 %vm113_vm1, %v1203_v25  ;;  %v1348_v28 = vpop.xlane.xlu1 %1347 }
 0xcfe   :  { %v1349_v31 = vsub.f32 %v1339_v40, %v1348_v28  ;;  %2589 = vmatprep.mubr.msk.bf16.mxu1 %vm2930_vm0, %v2929_v0 }
 0xd00   :  { %v1350_v30 = vmul.f32 1.442695, %v1349_v31 }
 0xd01   :  { %v1361_v32 = vpop.permute.xlu1 %1360 }
 0xd02   :  { %2771 = vpow2.f32 %v1350_v30  ;;  %2586 = vmatpush3.bf16.msra.mxu1 %v1361_v32 }
 0xd03   :  { %2587 = vmatprep.subr.bf16.mxu1 %v2929_v0 }
 0xd0c   :  { %v2772_v19 = vpop.eup %2771 }
 0xd0d   :  { %v1352_v61 = vsel %vm1345_vm8, %v2772_v19, 0.0 }
 0xd0e   :  { %1353 = vadd.xlane.f32.xlu1 %v1352_v61 }
 0xd1f   :  { %1478 = vrot.lane.b32.xlu1 %v3266_v59, %s2934_s20 }
 0xd23   :  { %1480 = vrot.lane.b32.xlu1 %v3264_v51, %s2934_s20 }
 0xd70   :  { %v1468_v26 = vpop.xlane.xlu0 %1467 }
 0xd71   :  { %v1469_v33 = vsub.f32 %v1460_v47, %v1468_v26 }
 0xd73   :  { %v1470_v34 = vmul.f32 1.442695, %v1469_v33 }
 0xd75   :  { %2773 = vpow2.f32 %v1470_v34 }
 0xd7f   :  { %v2774_v35 = vpop.eup %2773 }
 0xd80   :  { %v1472_v1 = vsel %vm1345_vm8, %v2774_v35, 0.0 }
 0xd81   :  { %1473 = vadd.xlane.f32.xlu0 %v1472_v1 }
 0xd97   :  { %1362 = vrot.lane.b32.xlu0 %v3264_v51, %s2932_s0 }
 0xd9b   :  { %v1354_v41 = vpop.xlane.xlu1 %1353 }
 0xd9c   :  { %2775 = vrcp.f32 %v1354_v41 }
 0xd9f   :  { %v1479_v2 = vpop.permute.xlu1 %1478 }
 0xda3   :  { %v1481_v44 = vpop.permute.xlu1 %1480 }
 0xda6   :  { %v2776_v42 = vpop.eup %2775 }
 0xda7   :  { %v1356_v43 = vmul.f32 %v2776_v42, %v2772_v19 }
 0xda9   :  { %v1357_v51 = vpack.c.bf16 %v1356_v43, %v1356_v43 }
 0xdd0   :  { %v2575_v36 = vpop.f32.mrb[32].mxu1 }
 0xdd1   :  { %v1278_v37 = vpop.f32.mrb[33].mxu1 }
 0xdd2   :  { %v2576_v38 = vpop.f32.mrb[34].mxu1 }
 0xdd3   :  { %v3334_v39 = vpack.c.bf16 %v2576_v38, %v2575_v36  ;;  %v1281_v59 = vpop.f32.mrb[35].mxu1 }
 0xdd4   :  { %v3336_v40 = vpack.c.bf16 %v1281_v59, %v1278_v37 }
 0xdd5   :  { %1600 = vrot.lane.b32.xlu1 %v3334_v39, %s2932_s0  ;;  %v1542_v47 = vsel %vm458_vm2, %v3334_v39, 0 }
 0xdd6   :  { %v1539_v58 = vsel %vm458_vm2, %v3336_v40, 0 }
 0xe0e   :  { %v1474_v55 = vpop.xlane.xlu0 %1473 }
 0xe0f   :  { %2777 = vrcp.f32 %v1474_v55 }
 0xe12   :  { %v1363_v62 = vpop.permute.xlu0 %1362 }
 0xe13   :  { %2588 = vmatpush3.bf16.msra.mxu1 %v1363_v62 }
 0xe14   :  { %2601 = vmatprep.subr.bf16.mxu1 %v2929_v0 }
 0xe16   :  { %2590 = vmatmul.mubr.msk.bf16.vlgmr.msra.gmra.mrb[36].mxu1 %vm113_vm1, %v1357_v51 }
 0xe17   :  { %2602 = vmatpush3.bf16.msra.mxu1 %v1479_v2  ;;  %2605 = vmatprep.mubr.msk.bf16.mxu1 %vm2930_vm0, %v2929_v0 }
 0xe18   :  { %2603 = vmatprep.subr.bf16.mxu1 %v2929_v0 }
 0xe19   :  { %v2778_v16 = vpop.eup %2777 }
 0xe1a   :  { %v1476_v45 = vmul.f32 %v2778_v16, %v2774_v35  ;;  %v2727_v16 = vld [vmem:[#allocation9 + $0x30] sm:$0xff]  }
 0xe1b   :  { %2604 = vmatpush3.bf16.msra.mxu1 %v1481_v44 }
 0xe1c   :  { %v1477_v46 = vpack.c.bf16 %v1476_v45, %v1476_v45  ;;  %2609 = vmatprep.subr.bf16.mxu1 %v2929_v0 }
 0xe1e   :  { %2606 = vmatmul.mubr.msk.bf16.vlgmr.msra.gmra.mrb[40].mxu1 %vm113_vm1, %v1477_v46 }
 0xe1f   :  { %2613 = vmatprep.mubr.msk.bf16.mxu1 %vm2930_vm0, %v2929_v0 }
 0xe24   :  { %2610 = vmatpush3.bf16.xpose.msra.mxu1 %v1539_v58 }
 0xe25   :  { %2611 = vmatprep.subr.bf16.mxu1 %v2929_v0 }
 0xe2c   :  { %2612 = vmatpush3.bf16.xpose.msra.mxu1 %v1542_v47  ;;  %v2729_v47 = vld [vmem:[#allocation9 + $0x40] sm:$0xff]  }
 0xe2d   :  { %2633 = vmatprep.subr.bf16.mxu1 %v2929_v0 }
 0xe33   :  { %2614 = vmatmul.mubr.msk.bf16.vlgmr.msra.gmra.mrb[44].mxu1 %vm458_vm2, %v1534_v48 }
 0xe34   :  { %2637 = vmatprep.mubr.msk.bf16.mxu1 %vm2930_vm0, %v2929_v0 }
 0xe47   :  { %v1601_v13 = vpop.permute.xlu1 %1600 }
 0xee9   :  { %v1403_v49 = vpop.f32.mrb[36].mxu1 }
 0xeea   :  { %1409 = vst.msk [vmem:[#allocation2] sm:$0xf] %vm569_vm6, %v1403_v49  ;;  %v2591_v50 = vpop.f32.mrb[37].mxu1 }
 0xeeb   :  { %v1406_v56 = vpop.f32.mrb[38].mxu1 }
 0xeec   :  { %v2592_v52 = vpop.f32.mrb[39].mxu1  ;;  %v1970_v56 = vsel %vm113_vm1, %v3145_v23, 0 }
 0xeed   :  { %v1973_v52 = vsel %vm113_vm1, %v3143_v21, 0 }
 0xef1   :  { %v1521_v53 = vpop.f32.mrb[40].mxu1 }
 0xef2   :  { %v2607_v54 = vpop.f32.mrb[41].mxu1 }
 0xef3   :  { %v1524_v57 = vpop.f32.mrb[42].mxu1  ;;  %v2730_v54 = vld [vmem:[#allocation9 + $0x48] sm:$0xff]  }
 0xef4   :  { %v2608_v60 = vpop.f32.mrb[43].mxu1  ;;  %v2359_v57 = vld [vmem:[%s3495_s6 + $0x9] ss:$0 sm:$0xff] }
 0xf06   :  { %v1578_v63 = vpop.f32.mrb[44].mxu1 }
 0xf07   :  { %v2615_v3 = vpop.f32.mrb[45].mxu1  ;;  %v1584_v4 = vsel %vm1345_vm8, %v1578_v63, -inf }
 0xf08   :  { %1585 = vmax.xlane.f32.xlu0 %v1584_v4  ;;  %v1581_v5 = vpop.f32.mrb[46].mxu1 }
 0xf09   :  { %v2616_v6 = vpop.f32.mrb[47].mxu1 }
 0xf1e   :  { %1598 = vrot.lane.b32.xlu0 %v3336_v40, %s2932_s0 }
 0xf22   :  { %1650 = vrot.lane.b32.xlu0 %v3336_v40, %s2933_s1 }
 0xf26   :  { %1648 = vrot.lane.b32.xlu0 %v1534_v48, %s2933_s1 }
 0xf95   :  { %v1586_v8 = vpop.xlane.xlu0 %1585 }
 0xf96   :  { %v1587_v9 = vsub.f32 %v1578_v63, %v1586_v8 }
 0xf98   :  { %v1588_v11 = vmul.f32 1.442695, %v1587_v9 }
 0xf99   :  { %v1599_v12 = vpop.permute.xlu0 %1598 }
 0xf9a   :  { %2779 = vpow2.f32 %v1588_v11  ;;  %2618 = vmatpush3.bf16.msra.mxu0 %v1599_v12  ;;  %v2363_v12 = vld [vmem:[%s3495_s6 + $0xb] ss:$0 sm:$0xff] }
 0xf9b   :  { %2619 = vmatprep.subr.bf16.mxu0 %v2929_v0 }
 0xf9d   :  { %v1651_v22 = vpop.permute.xlu0 %1650 }
 0xf9e   :  { %2620 = vmatpush3.bf16.msra.mxu0 %v1601_v13  ;;  %v1658_v24 = vsel %vm458_vm2, %v1651_v22, 0 }
 0xf9f   :  { %2625 = vmatprep.subr.bf16.mxu0 %v2929_v0 }
 0xfa1   :  { %v1649_v31 = vpop.permute.xlu0 %1648 }
 0xfa4   :  { %v2780_v14 = vpop.eup %2779 }
 0xfa5   :  { %v1590_v15 = vsel %vm1345_vm8, %v2780_v14, 0.0 }
 0xfa6   :  { %1591 = vadd.xlane.f32.xlu1 %v1590_v15 }
 0xfb7   :  { %1652 = vrot.lane.b32.xlu1 %v3334_v39, %s2933_s1 }
0x1033   :  { %v1592_v10 = vpop.xlane.xlu1 %1591 }
0x1034   :  { %2781 = vrcp.f32 %v1592_v10 }
0x1037   :  { %v1653_v25 = vpop.permute.xlu1 %1652 }
0x1038   :  { %v1661_v28 = vsel %vm458_vm2, %v1653_v25, 0  ;;  %v1913_v25 = vstv %s3496_s7 }
0x103e   :  { %v2782_v18 = vpop.eup %2781 }
0x103f   :  { %v1594_v20 = vmul.f32 %v2782_v18, %v2780_v14 }
0x1041   :  { %v1595_v17 = vpack.c.bf16 %v1594_v20, %v1594_v20  ;;  %v2367_v20 = vld [vmem:[%s3495_s6 + $0xc] ss:$0 sm:$0xff] }
0x1043   :  { %2622 = vmatmul.mubr.msk.bf16.vlgmr.msra.gmra.mrb[40].mxu0 %vm113_vm1, %v1595_v17 }
0x1044   :  { %2626 = vmatpush3.bf16.xpose.msra.mxu0 %v1658_v24  ;;  %2629 = vmatprep.mubr.msk.bf16.mxu0 %vm2930_vm0, %v2929_v0 }
0x1045   :  { %2627 = vmatprep.subr.bf16.mxu0 %v2929_v0 }
0x104c   :  { %2628 = vmatpush3.bf16.xpose.msra.mxu0 %v1661_v28 }
0x104d   :  { %2649 = vmatprep.subr.bf16.mxu0 %v2929_v0 }
0x1053   :  { %2630 = vmatmul.mubr.msk.bf16.vlgmr.msra.gmra.mrb[44].mxu0 %vm458_vm2, %v1649_v31 }
0x1054   :  { %2653 = vmatprep.mubr.msk.bf16.mxu0 %vm2930_vm0, %v2929_v0  ;;  %2650 = vmatpush3.bf16.msra.mxu0 %v2729_v47 }
0x1055   :  { %2651 = vmatprep.subr.bf16.mxu0 %v2929_v0 }
0x1058   :  { %2652 = vmatpush3.bf16.msra.mxu0 %v2730_v54 }
0x1059   :  { %2665 = vmatprep.subr.bf16.mxu0 %v2929_v0 }
0x1116   :  { %v1641_v30 = vpop.f32.mrb[40].mxu0 }
0x1117   :  { %1647 = vst.msk [vmem:[#allocation2 + $0x4] sm:$0xf] %vm569_vm6, %v1641_v30  ;;  %v2623_v32 = vpop.f32.mrb[41].mxu0 }
0x1118   :  { %v1644_v19 = vpop.f32.mrb[42].mxu0 }
0x1119   :  { %v2624_v61 = vpop.f32.mrb[43].mxu0 }
0x1126   :  { %v1697_v26 = vpop.f32.mrb[44].mxu0 }
0x1127   :  { %v2631_v33 = vpop.f32.mrb[45].mxu0  ;;  %v1703_v34 = vsel %vm1345_vm8, %v1697_v26, -inf }
0x1128   :  { %1704 = vmax.xlane.f32.xlu1 %v1703_v34  ;;  %v1700_v35 = vpop.f32.mrb[46].mxu0 }
0x1129   :  { %v2632_v1 = vpop.f32.mrb[47].mxu0 }
0x1139   :  { %1717 = vrot.lane.b32.xlu1 %v3334_v39, %s2934_s20 }
0x113d   :  { %1528 = vrot.lane.b32.xlu1 %v1521_v53, %s2935_s24  ;;  %v3411_v53 = vpack.c.bf16 %v3061_v7, %v3061_v7 }
0x11b5   :  { %v1705_v36 = vpop.xlane.xlu1 %1704 }
0x11b6   :  { %v1706_v37 = vsub.f32 %v1697_v26, %v1705_v36 }
0x11b8   :  { %v1707_v38 = vmul.f32 1.442695, %v1706_v37 }
0x11b9   :  { %v1718_v59 = vpop.permute.xlu1 %1717 }
0x11ba   :  { %2783 = vpow2.f32 %v1707_v38  ;;  %v1940_v38 = vlaneseq }
0x11bd   :  { %v1529_v41 = vpop.permute.xlu1 %1528 }
0x11be   :  { %1531 = vst.msk [vmem:[#allocation2] sm:$0xf] %vm686_vm7, %v1529_v41 }
0x11c4   :  { %v2784_v42 = vpop.eup %2783 }
0x11c5   :  { %v1709_v55 = vsel %vm1345_vm8, %v2784_v42, 0.0 }
0x11c6   :  { %1710 = vadd.xlane.f32.xlu0 %v1709_v55 }
0x11dc   :  { %1715 = vrot.lane.b32.xlu0 %v3336_v40, %s2934_s20  ;;  %v2728_v40 = vld [vmem:[#allocation9 + $0x38] sm:$0xff]  }
0x1253   :  { %v1711_v43 = vpop.xlane.xlu0 %1710 }
0x1254   :  { %2785 = vrcp.f32 %v1711_v43 }
0x1257   :  { %v1716_v39 = vpop.permute.xlu0 %1715 }
0x1258   :  { %2634 = vmatpush3.bf16.msra.mxu1 %v1716_v39 }
0x1259   :  { %2635 = vmatprep.subr.bf16.mxu1 %v2929_v0 }
0x125c   :  { %2636 = vmatpush3.bf16.msra.mxu1 %v1718_v59  ;;  %v1941_v59 = vshrl.u32 %v1940_v38, 7 }
0x125d   :  { %2641 = vmatprep.subr.bf16.mxu1 %v2929_v0 }
0x125e   :  { %v2786_v62 = vpop.eup %2785  ;;  %v1942_v41 = vsub.s32 0, %v1941_v59  ;;  %v1953_v55 = vsub.s32 2, %v1941_v59  ;;  %v2082_v43 = vsub.s32 4, %v1941_v59  ;;  %v2087_v39 = vsub.s32 5, %v1941_v59 }
0x125f   :  { %v1713_v51 = vmul.f32 %v2786_v62, %v2784_v42  ;;  %v1947_v42 = vsub.s32 1, %v1941_v59  ;;  %v2093_v62 = vsub.s32 6, %v1941_v59 }
0x1261   :  { %v1714_v2 = vpack.c.bf16 %v1713_v51, %v1713_v51  ;;  %v2099_v51 = vsub.s32 7, %v1941_v59 }
0x1263   :  { %2638 = vmatmul.mubr.msk.bf16.vlgmr.msra.gmra.mrb[48].mxu1 %vm113_vm1, %v1714_v2  ;;  %v1959_v2 = vsub.s32 3, %v1941_v59 }
0x1264   :  { %2645 = vmatprep.mubr.msk.bf16.mxu1 %vm2930_vm0, %v2929_v0  ;;  %2642 = vmatpush3.bf16.msra.mxu1 %v2727_v16 }
0x1265   :  { %2643 = vmatprep.subr.bf16.mxu1 %v2929_v0 }
0x1268   :  { %2644 = vmatpush3.bf16.msra.mxu1 %v2728_v40  ;;  %v1922_v40 = vld [vmem:[#allocation7] sm:$0xf] }
0x1269   :  { %2657 = vmatprep.subr.bf16.mxu1 %v2929_v0 }
0x1336   :  { %v1758_v44 = vpop.f32.mrb[48].mxu1 }
0x1337   :  { %1765 = vrot.lane.b32.xlu0 %v1758_v44, %s2935_s24  ;;  %v2639_v45 = vpop.f32.mrb[49].mxu1  ;;  %v1924_v44 = vld [vmem:[#allocation7 + $0x4] sm:$0xf] }
0x1338   :  { %v1761_v46 = vpop.f32.mrb[50].mxu1  ;;  %v1926_v45 = vld [vmem:[#allocation7 + $0x8] sm:$0xf] }
0x1339   :  { %v2640_v58 = vpop.f32.mrb[51].mxu1  ;;  %v1928_v46 = vld [vmem:[#allocation7 + $0xc] sm:$0xf] }
0x13a9   :  { %v1766_v48 = vpop.permute.xlu0 %1765 }
0x13aa   :  { %1768 = vst.msk [vmem:[#allocation2 + $0x4] sm:$0xf] %vm686_vm7, %v1766_v48 }
0x13b1   :  { %v1769_v49 = vld [vmem:[#allocation2] sm:$0xff] }
0x13b2   :  { %v1775_v50 = vpack.c.bf16 %v1769_v49, %v1769_v49 }
0x13b4   :  { %2646 = vmatmul.mubr.msk.bf16.vlgmr.msra.gmra.mrb[52].mxu1 %vm113_vm1, %v1775_v50 }
0x13b5   :  { %2658 = vmatpush3.bf16.xpose.msra.mxu1 %v1970_v56  ;;  %2661 = vmatprep.mubr.msk.bf16.mxu1 %vm2930_vm0, %v2929_v0 }
0x13b6   :  { %2659 = vmatprep.subr.bf16.mxu1 %v2929_v0 }
0x13bd   :  { %2660 = vmatpush3.bf16.xpose.msra.mxu1 %v1973_v52 }
0x13be   :  { %2681 = vmatprep.subr.bf16.mxu1 %v2929_v0 }
0x13c4   :  { %2662 = vmatmul.mubr.msk.bf16.vlgmr.msra.gmra.mrb[56].mxu1 %vm113_vm1, %v3411_v53 }
0x13c5   :  { %2685 = vmatprep.mubr.msk.bf16.mxu1 %vm2930_vm0, %v2929_v0 }
0x1487   :  { %v1830_v60 = vpop.f32.mrb[52].mxu1 }
0x1488   :  { %v1831_v63 = vadd.f32 %v2359_v57, %v1830_v60  ;;  %v2647_v3 = vpop.f32.mrb[53].mxu1 }
0x1489   :  { %v1833_v4 = vpop.f32.mrb[54].mxu1 }
0x148a   :  { %v1841_v7 = vpack.c.bf16 %v1831_v63, %v1831_v63  ;;  %v2648_v5 = vpop.f32.mrb[55].mxu1 }
0x148c   :  { %2654 = vmatmul.mubr.msk.bf16.vlgmr.msra.gmra.mrb[48].mxu0 %vm113_vm1, %v1841_v7 }
0x148d   :  { %2669 = vmatprep.mubr.msk.bf16.mxu0 %vm2930_vm0, %v2929_v0 }
0x1497   :  { %v3424_v6 = vpop.f32.mrb[56].mxu1 }
0x1498   :  { %v2663_v8 = vpop.f32.mrb[57].mxu1 }
0x1499   :  { %v2012_v9 = vpop.f32.mrb[58].mxu1 }
0x149a   :  { %v2664_v11 = vpop.f32.mrb[59].mxu1 }
0x155f   :  { %v1896_v13 = vpop.f32.mrb[48].mxu0 }
0x1560   :  { %v1897_v14 = vadd.f32 %v2363_v12, %v1896_v13  ;;  %v2655_v15 = vpop.f32.mrb[49].mxu0 }
0x1561   :  { %v1899_v10 = vpop.f32.mrb[50].mxu0 }
0x1562   :  { %2787 = vtanh.f32 %v1897_v14  ;;  %v2656_v18 = vpop.f32.mrb[51].mxu0 }
0x156c   :  { %v2788_v22 = vpop.eup %2787 }
0x156d   :  { %v1908_v17 = vmul.f32 %v2788_v22, %v2367_v20 }
0x156f   :  { %v1909_v24 = vsel %vm113_vm1, %v1908_v17, 0.0 }
0x1570   :  { %1910 = vadd.xlane.f32.xlu1 %v1909_v24 }
0x1581   :  { %2030 = vrot.lane.b32.xlu1 %v3145_v23, %s2932_s0  ;;  %v2368_v23 = vld [vmem:[%s3492_s3] ss:$0 sm:$0xff] }
0x15fd   :  { %v1911_v28 = vpop.xlane.xlu1 %1910 }
0x15fe   :  { %v1914_v31 = vadd.f32 %v1913_v25, %v1911_v28 }
0x1600   :  { %v1915_v30 = vsub.f32 0.0, %v1914_v31 }
0x1601   :  { %v2031_v32 = vpop.permute.xlu1 %2030 }
0x1602   :  { %v1916_v19 = vmul.f32 1.442695, %v1915_v30  ;;  %2666 = vmatpush3.bf16.msra.mxu0 %v2031_v32 }
0x1603   :  { %2667 = vmatprep.subr.bf16.mxu0 %v2929_v0 }
0x1604   :  { %2789 = vpow2.f32 %v1916_v19  ;;  %v2111_v19 = vsel %vm113_vm1, %v3149_v29, 0 }
0x160e   :  { %v2790_v61 = vpop.eup %2789 }
0x160f   :  { %v1918_v26 = vadd.f32 1.0, %v2790_v61  ;;  %v2106_v61 = vrot.slane %v3411_v53, 2 }
0x1611   :  { %2791 = vrcp.f32 %v1918_v26 }
0x161b   :  { %v2792_v33 = vpop.eup %2791 }
0x161c   :  { %v1920_v34 = vmul.f32 8.0, %v2792_v33 }
0x161e   :  { %v1935_v35 = vsub.f32 %v2368_v23, %v1920_v34 }
0x1620   :  { %v1936_v1 = vmul.f32 %v1935_v35, %v1935_v35 }
0x1622   :  { %v1937_v36 = vmul.f32 -0.055555556, %v1936_v1 }
0x1624   :  { %v1938_v37 = vmul.f32 1.442695, %v1937_v36 }
0x1626   :  { %2793 = vpow2.f32 %v1938_v37 }
0x1630   :  { %v2794_v16 = vpop.eup %2793 }
0x1631   :  { %v1943_v58 = vrot.slane %v2794_v16, %v1942_v41  ;;  %v1948_v47 = vrot.slane %v2794_v16, %v1947_v42  ;;  %v1954_v48 = vrot.slane %v2794_v16, %v1953_v55  ;;  %v2083_v49 = vrot.slane %v2794_v16, %v2082_v43 }
0x1632   :  { %v2088_v50 = vrot.slane %v2794_v16, %v2087_v39  ;;  %v2094_v56 = vrot.slane %v2794_v16, %v2093_v62  ;;  %v2100_v52 = vrot.slane %v2794_v16, %v2099_v51  ;;  %v1960_v60 = vrot.slane %v2794_v16, %v1959_v2 }
0x1633   :  { %v1944_v54 = vmul.f32 %v1943_v58, %v1922_v40  ;;  %v1949_v57 = vmul.f32 %v1948_v47, %v1924_v44  ;;  %v2084_v63 = vmul.f32 %v2083_v49, %v1922_v40  ;;  %v1955_v8 = vmul.f32 %v1954_v48, %v1926_v45  ;;  %v2731_v40 = vld [vmem:[#allocation9 + $0x50] sm:$0xff]  }
0x1634   :  { %v2089_v3 = vmul.f32 %v2088_v50, %v1924_v44  ;;  %v2095_v4 = vmul.f32 %v2094_v56, %v1926_v45  ;;  %v2101_v7 = vmul.f32 %v2100_v52, %v1928_v46  ;;  %v1961_v12 = vmul.f32 %v1960_v60, %v1928_v46  ;;  %v2732_v44 = vld [vmem:[#allocation9 + $0x58] sm:$0xff]   ;;  %v2373_v49 = vld [vmem:[%s3495_s6 + $0xd] ss:$0 sm:$0xff] }
0x1635   :  { %v1950_v5 = vadd.f32 %v1949_v57, %v1944_v54 }
0x1636   :  { %v2090_v9 = vadd.f32 %v2089_v3, %v2084_v63 }
0x1637   :  { %v1956_v11 = vadd.f32 %v1955_v8, %v1950_v5 }
0x1638   :  { %v2096_v13 = vadd.f32 %v2095_v4, %v2090_v9 }
0x1639   :  { %v1962_v14 = vadd.f32 %v1961_v12, %v1956_v11 }
0x163a   :  { %v2102_v15 = vadd.f32 %v2101_v7, %v2096_v13 }
0x163b   :  { %v2015_v10 = vmul.f32 %v3424_v6, %v1962_v14 }
0x163d   :  { %v2016_v18 = vsel %vm1345_vm8, %v2015_v10, -inf }
0x163e   :  { %2017 = vmax.xlane.f32.xlu0 %v2016_v18 }
0x16cb   :  { %v2018_v20 = vpop.xlane.xlu0 %2017 }
0x16cc   :  { %v2019_v22 = vsub.f32 %v2015_v10, %v2018_v20 }
0x16ce   :  { %v2020_v17 = vmul.f32 1.442695, %v2019_v22 }
0x16d0   :  { %2795 = vpow2.f32 %v2020_v17 }
0x16da   :  { %v2796_v24 = vpop.eup %2795 }
0x16db   :  { %v2022_v25 = vsel %vm1345_vm8, %v2796_v24, 0.0 }
0x16dc   :  { %2023 = vadd.xlane.f32.xlu0 %v2022_v25 }
0x16f2   :  { %2032 = vrot.lane.b32.xlu0 %v3143_v21, %s2932_s0  ;;  %v2114_v21 = vsel %vm113_vm1, %v3147_v27, 0 }
0x1769   :  { %v2024_v28 = vpop.xlane.xlu0 %2023 }
0x176a   :  { %2797 = vrcp.f32 %v2024_v28 }
0x176d   :  { %v2033_v31 = vpop.permute.xlu0 %2032 }
0x176e   :  { %2668 = vmatpush3.bf16.msra.mxu0 %v2033_v31 }
0x176f   :  { %2673 = vmatprep.subr.bf16.mxu0 %v2929_v0 }
0x1774   :  { %v2798_v6 = vpop.eup %2797 }
0x1775   :  { %v2026_v30 = vmul.f32 %v2798_v6, %v2796_v24 }
0x1777   :  { %v2027_v32 = vpack.c.bf16 %v2026_v30, %v2026_v30 }
0x1779   :  { %2670 = vmatmul.mubr.msk.bf16.vlgmr.msra.gmra.mrb[52].mxu0 %vm113_vm1, %v2027_v32 }
0x177a   :  { %2674 = vmatpush3.bf16.xpose.msra.mxu0 %v2111_v19  ;;  %2677 = vmatprep.mubr.msk.bf16.mxu0 %vm2930_vm0, %v2929_v0 }
0x177b   :  { %2675 = vmatprep.subr.bf16.mxu0 %v2929_v0 }
0x1782   :  { %2676 = vmatpush3.bf16.xpose.msra.mxu0 %v2114_v21 }
0x1789   :  { %2678 = vmatmul.mubr.msk.bf16.vlgmr.msra.gmra.mrb[56].mxu0 %vm113_vm1, %v2106_v61 }
0x184c   :  { %v2073_v26 = vpop.f32.mrb[52].mxu0 }
0x184d   :  { %2079 = vst.msk [vmem:[#allocation2] sm:$0xf] %vm1345_vm8, %v2073_v26  ;;  %v2671_v33 = vpop.f32.mrb[53].mxu0 }
0x184e   :  { %v2076_v23 = vpop.f32.mrb[54].mxu0 }
0x184f   :  { %v2672_v34 = vpop.f32.mrb[55].mxu0 }
0x185c   :  { %v2150_v35 = vpop.f32.mrb[56].mxu0 }
0x185d   :  { %v2156_v1 = vmul.f32 %v2150_v35, %v2102_v15  ;;  %v2679_v36 = vpop.f32.mrb[57].mxu0 }
0x185e   :  { %v2153_v37 = vpop.f32.mrb[58].mxu0 }
0x185f   :  { %v2680_v38 = vpop.f32.mrb[59].mxu0  ;;  %v2157_v59 = vsel %vm1345_vm8, %v2156_v1, -inf }
0x1860   :  { %2158 = vmax.xlane.f32.xlu1 %v2157_v59 }
0x1871   :  { %2171 = vrot.lane.b32.xlu1 %v3149_v29, %s2932_s0 }
0x18ed   :  { %v2159_v53 = vpop.xlane.xlu1 %2158 }
0x18ee   :  { %v2160_v41 = vsub.f32 %v2156_v1, %v2159_v53 }
0x18f0   :  { %v2161_v42 = vmul.f32 1.442695, %v2160_v41 }
0x18f1   :  { %v2172_v55 = vpop.permute.xlu1 %2171 }
0x18f2   :  { %2799 = vpow2.f32 %v2161_v42  ;;  %2682 = vmatpush3.bf16.msra.mxu1 %v2172_v55 }
0x18f3   :  { %2683 = vmatprep.subr.bf16.mxu1 %v2929_v0 }
0x18fc   :  { %v2800_v43 = vpop.eup %2799 }
0x18fd   :  { %v2163_v39 = vsel %vm1345_vm8, %v2800_v43, 0.0 }
0x18fe   :  { %2164 = vadd.xlane.f32.xlu0 %v2163_v39 }
0x1914   :  { %2173 = vrot.lane.b32.xlu0 %v3147_v27, %s2932_s0  ;;  %s2936_s0 = smov [#allocation12]  }
0x1915   :  { %s2295_s21 = sshll.u32 %s2936_s0, 4  ;;  %s2296_s21 = int_to_ptr.vmem [resolvable:$true] %s2295_s21 }
0x1916   :  { %s2891_s22 = scalar_lea.vmem %s2296_s21, 128  ;;  %p2896_p5 = scmp.lt.s32.totalorder %s2296_s21, %s2296_s21 }
0x1917   :  { %p2892_p4 = scmp.ne.s32.totalorder %s2296_s21, %s2891_s22  ;;  %p2897_p6 = scmp.lt.s32.totalorder %s2891_s22, %s2891_s22 }
0x1919   :  { %p2898_p7 = por %p2897_p6, %p2896_p5 }
0x191b   :  { %p2899_p8 = pnand %p2898_p7, %p2892_p4 }
0x198b   :  { %v2165_v62 = vpop.xlane.xlu0 %2164 }
0x198c   :  { %2801 = vrcp.f32 %v2165_v62 }
0x198f   :  { %v2174_v51 = vpop.permute.xlu0 %2173 }
0x1990   :  { %2684 = vmatpush3.bf16.msra.mxu1 %v2174_v51 }
0x1991   :  { %2689 = vmatprep.subr.bf16.mxu1 %v2929_v0 }
0x1996   :  { %v2802_v29 = vpop.eup %2801 }
0x1997   :  { %v2167_v2 = vmul.f32 %v2802_v29, %v2800_v43 }
0x1999   :  { %v2168_v16 = vpack.c.bf16 %v2167_v2, %v2167_v2 }
0x199b   :  { %2686 = vmatmul.mubr.msk.bf16.vlgmr.msra.gmra.mrb[60].mxu1 %vm113_vm1, %v2168_v16 }
0x199c   :  { %2693 = vmatprep.mubr.msk.bf16.mxu1 %vm2930_vm0, %v2929_v0  ;;  %2690 = vmatpush3.bf16.msra.mxu1 %v2731_v40 }
0x199d   :  { %2691 = vmatprep.subr.bf16.mxu1 %v2929_v0 }
0x19a0   :  { %2692 = vmatpush3.bf16.msra.mxu1 %v2732_v44 }
0x1a6e   :  { %v2214_v27 = vpop.f32.mrb[60].mxu1 }
0x1a6f   :  { %2220 = vst.msk [vmem:[#allocation2 + $0x4] sm:$0xf] %vm1345_vm8, %v2214_v27  ;;  %v2687_v45 = vpop.f32.mrb[61].mxu1 }
0x1a70   :  { %v2217_v46 = vpop.f32.mrb[62].mxu1 }
0x1a71   :  { %v2688_v58 = vpop.f32.mrb[63].mxu1 }
0x1a76   :  { %v2221_v47 = vld [vmem:[#allocation2] sm:$0xff] }
0x1a77   :  { %v2227_v48 = vpack.c.bf16 %v2221_v47, %v2221_v47 }
0x1a79   :  { %2694 = vmatmul.mubr.msk.bf16.vlgmr.msra.gmra.mrb[64].mxu1 %vm113_vm1, %v2227_v48 }
0x1b4c   :  { %v2282_v50 = vpop.f32.mrb[64].mxu1 }
0x1b4d   :  { %v2283_v56 = vadd.f32 %v2373_v49, %v2282_v50  ;;  %v2695_v0 = vpop.f32.mrb[65].mxu1 }
0x1b4e   :  { %v2285_v52 = vpop.f32.mrb[66].mxu1 }
0x1b4f   :  { %2288 = vst.msk [vmem:[#allocation12] sm:$0xff] %vm113_vm1, %v2283_v56  ;;  %v2696_v54 = vpop.f32.mrb[67].mxu1 }
0x1b50   :  { %2902 = shalt.err (!%p2899_p8)
}
0x1b51   :  { %s2903_s6 = scalar_lea.hbm %s3497_s8, 128 }
0x1b52   :  { %p2904_p9 = scmp.ne.s32.totalorder %s3497_s8, %s2903_s6  ;;  %p2907_p10 = scmp.lt.u32.totalorder %s2903_s6, %s3497_s8 }
0x1b54   :  { %p2909_p11 = pnand %p2907_p10, %p2904_p9 }
0x1b56   :  { %2912 = shalt.err (!%p2909_p11)
}
0x1b57   :  { %2298 = dma.vmem_to_hbm [thread:$0]  %s2296_s21, 128, %s3497_s8, [#allocation6]  }
0x1b58   :  { %2919 = dma.done.wait [#allocation6], 128  }
0x1b59   :  { %2920 = vsyncadd [#allocation6], 4294967168 }
0x1b5a   :  { %2302 = vsyncpa [#allocation5], 1 }
0x1b5b   :  { %2303 = vsyncpa [#allocation8], 1 }
0x1b5c   :  { %2304 = vsyncpa [#allocation11], 1 }
0x1b5d   :  { %2305 = vsyncpa [#allocation6], 1 }

</bundles_post_ra>
